<compile_context>
chip_gen: v5e
topology: v5e:2x2
jax: 0.10.0
libtpu: 0.0.40
codegen_flags: <defaults>
</compile_context>

<pallas_src>
import math
import jax
import jax.numpy as jnp
from jax.experimental import pallas as pl
from jax.experimental.pallas import tpu as pltpu

B, S, D = 2, 8, 32          # batch, target sequence length, d_model
H, HD = 4, 8                # nhead, head_dim (D == H * HD)
DFF = 64                    # dim_feedforward
NUM_LAYERS = 2
EPS = 1e-5                  # PyTorch LayerNorm default eps

# ---------------- packed-parameter layout: single (PACK_ROWS, 128) f32 operand --------
R_WQKV = 0                  # rows [  0, 32)  cols [0, 96) : wqkv (D, 3D), Q cols pre-scaled
R_WO   = R_WQKV + D         # rows [ 32, 64)  cols [0, 32) : wo   (D, D)
R_W1   = R_WO + D           # rows [ 64, 96)  cols [0, 64) : w1   (D, DFF)
R_W2   = R_W1 + D           # rows [ 96,160)  cols [0, 32) : w2   (DFF, D)
R_VEC  = R_W2 + DFF         # rows [160,176)  cols [0,128) : packed bias / LN vectors
R_BIAS = R_VEC + 16         # rows [176,240)  cols [0,  8) : attn bias stacked (H*B*S, S)
PACK_ROWS, PACK_COLS = R_BIAS + H * B * S, 128

# rows inside the vec block
ROW_BQKV, ROW_BO, ROW_B1, ROW_B2 = 0, 1, 2, 3
ROW_G1, ROW_BE1, ROW_G2, ROW_BE2, ROW_GF, ROW_BF = 4, 5, 6, 7, 8, 9


def _layernorm(x, g, b):
    mu = jnp.mean(x, axis=-1, keepdims=True)
    var = jnp.mean(jnp.square(x - mu), axis=-1, keepdims=True)
    return (x - mu) * jax.lax.rsqrt(var + EPS) * g + b


def fused_decoder_stack_kernel(x_ref, pack_ref, o_ref):
    # ---- unpack parameters once (static slices of the single packed VMEM operand) ----
    wqkv = pack_ref[R_WQKV:R_WQKV + D, 0:3 * D]          # (D, 3D), Q cols pre-scaled
    wo   = pack_ref[R_WO:R_WO + D, 0:D]                  # (D, D)
    w1   = pack_ref[R_W1:R_W1 + D, 0:DFF]                # (D, DFF)
    w2   = pack_ref[R_W2:R_W2 + DFF, 0:D]                # (DFF, D)

    vrow = lambda r, n: pack_ref[R_VEC + r:R_VEC + r + 1, 0:n]   # (1, n)
    bqkv = vrow(ROW_BQKV, 3 * D)
    bo, b1, b2 = vrow(ROW_BO, D), vrow(ROW_B1, DFF), vrow(ROW_B2, D)
    g1, be1 = vrow(ROW_G1, D), vrow(ROW_BE1, D)
    g2, be2 = vrow(ROW_G2, D), vrow(ROW_BE2, D)
    gf, bf = vrow(ROW_GF, D), vrow(ROW_BF, D)

    # additive attention bias, pre-expanded host-side to the (h, b, s) stacked layout
    bias3 = pack_ref[R_BIAS:R_BIAS + H * B * S, 0:S].reshape(H * B, S, S)

    x = x_ref[...]                                       # (B*S, D), whole batch resident

    for _ in range(NUM_LAYERS):                          # static unroll; shared params
        # ---- fused QKV projection: one (B*S,D)@(D,3D) matmul ----
        qkv = jnp.dot(x, wqkv, preferred_element_type=jnp.float32) + bqkv   # (B*S, 3D)

        # ---- stack heads along sublanes, batch element = (h, b): (H*B, S, HD) ----
        q3 = jnp.concatenate(
            [qkv[:, h * HD:(h + 1) * HD] for h in range(H)], axis=0).reshape(H * B, S, HD)
        k3 = jnp.concatenate(
            [qkv[:, D + h * HD:D + (h + 1) * HD] for h in range(H)], axis=0).reshape(H * B, S, HD)
        v3 = jnp.concatenate(
            [qkv[:, 2 * D + h * HD:2 * D + (h + 1) * HD] for h in range(H)], axis=0).reshape(H * B, S, HD)

        # ---- batched attention: 2 einsums + ONE softmax for all (batch, head) ----
        s = jnp.einsum('bqd,bkd->bqk', q3, k3,
                       preferred_element_type=jnp.float32) + bias3          # (H*B, S, S)
        m = jnp.max(s, axis=-1, keepdims=True)
        p = jnp.exp(s - m)
        p = p * pl.reciprocal(jnp.sum(p, axis=-1, keepdims=True), approx=False)
        ctx3 = jnp.einsum('bqk,bkd->bqd', p, v3,
                          preferred_element_type=jnp.float32)               # (H*B, S, HD)

        # ---- re-interleave heads along lanes and project: one (B*S,D)@(D,D) matmul ----
        ctx_flat = ctx3.reshape(H * B * S, HD)
        ctx = jnp.concatenate(
            [ctx_flat[h * B * S:(h + 1) * B * S, :] for h in range(H)], axis=1)   # (B*S, D)
        attn = jnp.dot(ctx, wo, preferred_element_type=jnp.float32) + bo

        # residual + norm1
        y = _layernorm(x + attn, g1, be1)

        # ---- feed-forward (linear1 -> relu -> linear2), residual + norm2 ----
        h1 = jnp.maximum(jnp.dot(y, w1, preferred_element_type=jnp.float32) + b1, 0.0)
        ff = jnp.dot(h1, w2, preferred_element_type=jnp.float32) + b2
        x = _layernorm(y + ff, g2, be2)

    # final LayerNorm of the decoder stack (self.norm), fused into the same kernel
    o_ref[...] = _layernorm(x, gf, bf)


def run_decoder_stack(tgt, pack):
    """Full DecoderOnlyTransformerDecoder forward as a single Pallas kernel call."""
    x_flat = tgt.reshape(B * S, D)
    vspec = pl.BlockSpec(memory_space=pltpu.MemorySpace.VMEM)
    out = pl.pallas_call(
        fused_decoder_stack_kernel,
        out_shape=jax.ShapeDtypeStruct((B * S, D), jnp.float32),
        in_specs=[vspec, vspec],
        out_specs=vspec,
    )(x_flat, pack)
    return out.reshape(B, S, D)


# ------------------------- parameter setup (glue, plain JAX) -------------------------

def init_layer_params_torch_shaped(key):
    """Deterministic params with the exact PyTorch module shapes."""
    ks = jax.random.split(key, 8)

    def rnd(k, shape, s=0.1):
        return jax.random.normal(k, shape, jnp.float32) * s

    return dict(
        in_proj_w=rnd(ks[0], (3 * D, D)),     # MultiheadAttention.in_proj_weight
        in_proj_b=rnd(ks[1], (3 * D,)),
        out_proj_w=rnd(ks[2], (D, D)),
        out_proj_b=rnd(ks[3], (D,)),
        lin1_w=rnd(ks[4], (DFF, D)),
        lin1_b=rnd(ks[5], (DFF,)),
        lin2_w=rnd(ks[6], (D, DFF)),
        lin2_b=rnd(ks[7], (D,)),
        norm1_w=jnp.ones((D,), jnp.float32), norm1_b=jnp.zeros((D,), jnp.float32),
        norm2_w=jnp.ones((D,), jnp.float32), norm2_b=jnp.zeros((D,), jnp.float32),
    )


def to_kernel_params(p, final_norm_w, final_norm_b, attn_bias):
    """Pre-transpose weights, fold the softmax scale into Q, pack EVERYTHING into
    one (PACK_ROWS, 128) VMEM operand (weights + biases + LN vectors + attn bias)."""
    scale = 1.0 / math.sqrt(HD)
    wqkv = p['in_proj_w'].T                              # (D, 3D): x @ wqkv = [q|k|v]
    wqkv = wqkv.at[:, :D].multiply(scale)                # fold 1/sqrt(HD) into Q cols
    bqkv = p['in_proj_b'].at[:D].multiply(scale)

    pack = jnp.zeros((PACK_ROWS, PACK_COLS), jnp.float32)
    pack = pack.at[R_WQKV:R_WQKV + D, 0:3 * D].set(wqkv)
    pack = pack.at[R_WO:R_WO + D, 0:D].set(p['out_proj_w'].T)
    pack = pack.at[R_W1:R_W1 + D, 0:DFF].set(p['lin1_w'].T)
    pack = pack.at[R_W2:R_W2 + DFF, 0:D].set(p['lin2_w'].T)

    pack = pack.at[R_VEC + ROW_BQKV, 0:3 * D].set(bqkv)
    pack = pack.at[R_VEC + ROW_BO, 0:D].set(p['out_proj_b'])
    pack = pack.at[R_VEC + ROW_B1, 0:DFF].set(p['lin1_b'])
    pack = pack.at[R_VEC + ROW_B2, 0:D].set(p['lin2_b'])
    pack = pack.at[R_VEC + ROW_G1, 0:D].set(p['norm1_w'])
    pack = pack.at[R_VEC + ROW_BE1, 0:D].set(p['norm1_b'])
    pack = pack.at[R_VEC + ROW_G2, 0:D].set(p['norm2_w'])
    pack = pack.at[R_VEC + ROW_BE2, 0:D].set(p['norm2_b'])
    pack = pack.at[R_VEC + ROW_GF, 0:D].set(final_norm_w)
    pack = pack.at[R_VEC + ROW_BF, 0:D].set(final_norm_b)

    # attention bias pre-expanded to the (h, b, s) stacked score layout: (H*B*S, S)
    bias_stack = jnp.tile(attn_bias.reshape(B * S, S), (H, 1))
    pack = pack.at[R_BIAS:R_BIAS + H * B * S, 0:S].set(bias_stack)
    return pack


# ------------------------------ pure-JAX reference -----------------------------------

def ref_decoder_layer(x, attn_bias, p):
    Wq, Wk, Wv = p['in_proj_w'][:D], p['in_proj_w'][D:2 * D], p['in_proj_w'][2 * D:]
    bq, bk, bv = p['in_proj_b'][:D], p['in_proj_b'][D:2 * D], p['in_proj_b'][2 * D:]
    q, k, v = x @ Wq.T + bq, x @ Wk.T + bk, x @ Wv.T + bv
    split = lambda t: t.reshape(B, S, H, HD).transpose(0, 2, 1, 3)
    qh, kh, vh = split(q), split(k), split(v)
    s = jnp.einsum('bhqd,bhkd->bhqk', qh, kh) / math.sqrt(HD) + attn_bias[:, None]
    a = jax.nn.softmax(s, axis=-1)
    ctx = jnp.einsum('bhqk,bhkd->bhqd', a, vh).transpose(0, 2, 1, 3).reshape(B, S, D)
    attn_out = ctx @ p['out_proj_w'].T + p['out_proj_b']

    def ln(t, g, b):
        mu = t.mean(-1, keepdims=True)
        var = ((t - mu) ** 2).mean(-1, keepdims=True)
        return (t - mu) / jnp.sqrt(var + EPS) * g + b

    y = ln(x + attn_out, p['norm1_w'], p['norm1_b'])
    ff = jnp.maximum(y @ p['lin1_w'].T + p['lin1_b'], 0.0) @ p['lin2_w'].T + p['lin2_b']
    return ln(y + ff, p['norm2_w'], p['norm2_b'])


if __name__ == "__main__":
    key = jax.random.PRNGKey(0)
    k_x, k_p = jax.random.split(key, 2)

    tgt = jax.random.normal(k_x, (B, S, D), jnp.float32)

    # tgt_mask: causal additive float mask (S, S); tgt_key_padding_mask: bool (B, S).
    causal = jnp.where(jnp.arange(S)[None, :] > jnp.arange(S)[:, None],
                       -1e9, 0.0).astype(jnp.float32)
    key_padding = jnp.zeros((B, S), bool).at[1, -2:].set(True)
    attn_bias = causal[None, :, :] + jnp.where(key_padding, -1e9, 0.0)[:, None, :]

    # _get_clones deep-copies one initialized layer => all layers share parameters.
    # TODO(synk): with trained checkpoints each layer has distinct weights; pack one
    # weight block per layer and index it in the layer loop.
    torch_params = init_layer_params_torch_shaped(k_p)
    norm_w = jnp.ones((D,), jnp.float32)     # final norm = LayerNorm(d_model)
    norm_b = jnp.zeros((D,), jnp.float32)
    pack = to_kernel_params(torch_params, norm_w, norm_b, attn_bias)

    out = run_decoder_stack(tgt, pack)

    # pure-JAX reference
    ref = tgt
    for _ in range(NUM_LAYERS):
        ref = ref_decoder_layer(ref, attn_bias, torch_params)
    mu = ref.mean(-1, keepdims=True)
    var = ((ref - mu) ** 2).mean(-1, keepdims=True)
    ref = (ref - mu) / jnp.sqrt(var + EPS) * norm_w + norm_b

    out = jax.block_until_ready(out)
    assert out.shape == (B, S, D)
    assert bool(jnp.all(jnp.isfinite(out)))
    assert bool(jnp.allclose(out, ref, atol=2e-2, rtol=2e-2))
    print("KERNEL_OK")
</pallas_src>

<mosaic_0001>
module attributes {stable_mosaic.version = 11 : i64} {
  func.func @fused_decoder_stack_kernel(%arg0: memref<16x32xf32, #tpu.memory_space<vmem>>, %arg1: memref<240x128xf32, #tpu.memory_space<vmem>>, %arg2: memref<16x32xf32, #tpu.memory_space<vmem>>) attributes {dimension_semantics = [], scalar_prefetch = 0 : i64, scratch_operands = 0 : i64, tpu.core_type = #tpu.core_type<tc>} {
    %c0 = arith.constant 0 : index
    %c0_0 = arith.constant 0 : index
    %0 = vector.load %arg1[%c0, %c0_0] : memref<240x128xf32, #tpu.memory_space<vmem>>, vector<32x96xf32>
    %c32 = arith.constant 32 : index
    %c0_1 = arith.constant 0 : index
    %1 = vector.load %arg1[%c32, %c0_1] : memref<240x128xf32, #tpu.memory_space<vmem>>, vector<32x32xf32>
    %c64 = arith.constant 64 : index
    %c0_2 = arith.constant 0 : index
    %2 = vector.load %arg1[%c64, %c0_2] : memref<240x128xf32, #tpu.memory_space<vmem>>, vector<32x64xf32>
    %c96 = arith.constant 96 : index
    %c0_3 = arith.constant 0 : index
    %3 = vector.load %arg1[%c96, %c0_3] : memref<240x128xf32, #tpu.memory_space<vmem>>, vector<64x32xf32>
    %c160 = arith.constant 160 : index
    %c0_4 = arith.constant 0 : index
    %4 = vector.load %arg1[%c160, %c0_4] : memref<240x128xf32, #tpu.memory_space<vmem>>, vector<1x96xf32>
    %c161 = arith.constant 161 : index
    %c0_5 = arith.constant 0 : index
    %5 = vector.load %arg1[%c161, %c0_5] : memref<240x128xf32, #tpu.memory_space<vmem>>, vector<1x32xf32>
    %c162 = arith.constant 162 : index
    %c0_6 = arith.constant 0 : index
    %6 = vector.load %arg1[%c162, %c0_6] : memref<240x128xf32, #tpu.memory_space<vmem>>, vector<1x64xf32>
    %c163 = arith.constant 163 : index
    %c0_7 = arith.constant 0 : index
    %7 = vector.load %arg1[%c163, %c0_7] : memref<240x128xf32, #tpu.memory_space<vmem>>, vector<1x32xf32>
    %c164 = arith.constant 164 : index
    %c0_8 = arith.constant 0 : index
    %8 = vector.load %arg1[%c164, %c0_8] : memref<240x128xf32, #tpu.memory_space<vmem>>, vector<1x32xf32>
    %c165 = arith.constant 165 : index
    %c0_9 = arith.constant 0 : index
    %9 = vector.load %arg1[%c165, %c0_9] : memref<240x128xf32, #tpu.memory_space<vmem>>, vector<1x32xf32>
    %c166 = arith.constant 166 : index
    %c0_10 = arith.constant 0 : index
    %10 = vector.load %arg1[%c166, %c0_10] : memref<240x128xf32, #tpu.memory_space<vmem>>, vector<1x32xf32>
    %c167 = arith.constant 167 : index
    %c0_11 = arith.constant 0 : index
    %11 = vector.load %arg1[%c167, %c0_11] : memref<240x128xf32, #tpu.memory_space<vmem>>, vector<1x32xf32>
    %c168 = arith.constant 168 : index
    %c0_12 = arith.constant 0 : index
    %12 = vector.load %arg1[%c168, %c0_12] : memref<240x128xf32, #tpu.memory_space<vmem>>, vector<1x32xf32>
    %c169 = arith.constant 169 : index
    %c0_13 = arith.constant 0 : index
    %13 = vector.load %arg1[%c169, %c0_13] : memref<240x128xf32, #tpu.memory_space<vmem>>, vector<1x32xf32>
    %c176 = arith.constant 176 : index
    %c0_14 = arith.constant 0 : index
    %14 = vector.load %arg1[%c176, %c0_14] : memref<240x128xf32, #tpu.memory_space<vmem>>, vector<64x8xf32>
    %15 = vector.shape_cast %14 : vector<64x8xf32> to vector<8x8x8xf32>
    %c0_15 = arith.constant 0 : index
    %c0_16 = arith.constant 0 : index
    %16 = vector.load %arg0[%c0_15, %c0_16] : memref<16x32xf32, #tpu.memory_space<vmem>>, vector<16x32xf32>
    %cst = arith.constant dense<0.000000e+00> : vector<16x96xf32>
    %17 = tpu.matmul %16, %0, %cst {dimension_numbers = #tpu.dot_dimension_numbers<[1], [0], [0], [1], [0, 0, 1, 1], [], []>} : vector<16x32xf32>, vector<32x96xf32>, vector<16x96xf32> -> vector<16x96xf32>
    %18 = vector.broadcast %4 : vector<1x96xf32> to vector<16x96xf32>
    %19 = arith.addf %17, %18 : vector<16x96xf32>
    %20 = vector.extract_strided_slice %19 {offsets = [0, 0], sizes = [16, 8], strides = [1, 1]} : vector<16x96xf32> to vector<16x8xf32>
    %21 = vector.extract_strided_slice %19 {offsets = [0, 8], sizes = [16, 8], strides = [1, 1]} : vector<16x96xf32> to vector<16x8xf32>
    %22 = vector.extract_strided_slice %19 {offsets = [0, 16], sizes = [16, 8], strides = [1, 1]} : vector<16x96xf32> to vector<16x8xf32>
    %23 = vector.extract_strided_slice %19 {offsets = [0, 24], sizes = [16, 8], strides = [1, 1]} : vector<16x96xf32> to vector<16x8xf32>
    %24 = tpu.concatenate %20, %21, %22, %23 in 0 : vector<16x8xf32>, vector<16x8xf32>, vector<16x8xf32>, vector<16x8xf32> -> vector<64x8xf32>
    %25 = vector.shape_cast %24 : vector<64x8xf32> to vector<8x8x8xf32>
    %26 = vector.extract_strided_slice %19 {offsets = [0, 32], sizes = [16, 8], strides = [1, 1]} : vector<16x96xf32> to vector<16x8xf32>
    %27 = vector.extract_strided_slice %19 {offsets = [0, 40], sizes = [16, 8], strides = [1, 1]} : vector<16x96xf32> to vector<16x8xf32>
    %28 = vector.extract_strided_slice %19 {offsets = [0, 48], sizes = [16, 8], strides = [1, 1]} : vector<16x96xf32> to vector<16x8xf32>
    %29 = vector.extract_strided_slice %19 {offsets = [0, 56], sizes = [16, 8], strides = [1, 1]} : vector<16x96xf32> to vector<16x8xf32>
    %30 = tpu.concatenate %26, %27, %28, %29 in 0 : vector<16x8xf32>, vector<16x8xf32>, vector<16x8xf32>, vector<16x8xf32> -> vector<64x8xf32>
    %31 = vector.shape_cast %30 : vector<64x8xf32> to vector<8x8x8xf32>
    %32 = vector.extract_strided_slice %19 {offsets = [0, 64], sizes = [16, 8], strides = [1, 1]} : vector<16x96xf32> to vector<16x8xf32>
    %33 = vector.extract_strided_slice %19 {offsets = [0, 72], sizes = [16, 8], strides = [1, 1]} : vector<16x96xf32> to vector<16x8xf32>
    %34 = vector.extract_strided_slice %19 {offsets = [0, 80], sizes = [16, 8], strides = [1, 1]} : vector<16x96xf32> to vector<16x8xf32>
    %35 = vector.extract_strided_slice %19 {offsets = [0, 88], sizes = [16, 8], strides = [1, 1]} : vector<16x96xf32> to vector<16x8xf32>
    %36 = tpu.concatenate %32, %33, %34, %35 in 0 : vector<16x8xf32>, vector<16x8xf32>, vector<16x8xf32>, vector<16x8xf32> -> vector<64x8xf32>
    %37 = vector.shape_cast %36 : vector<64x8xf32> to vector<8x8x8xf32>
    "tpu.trace_start"() <{level = 10 : i32, message = "bqd,bkd->bqk"}> : () -> ()
    %cst_17 = arith.constant dense<0.000000e+00> : vector<8x8x8xf32>
    %38 = tpu.matmul %25, %31, %cst_17 {dimension_numbers = #tpu.dot_dimension_numbers<[2], [2], [1], [1], [0, 0, 0, 1, 1, 1], [0], [0]>} : vector<8x8x8xf32>, vector<8x8x8xf32>, vector<8x8x8xf32> -> vector<8x8x8xf32>
    "tpu.trace_stop"() : () -> ()
    %39 = arith.addf %38, %15 : vector<8x8x8xf32>
    %cst_18 = arith.constant dense<0xFF800000> : vector<8x8xf32>
    %40 = vector.multi_reduction <maximumf>, %39, %cst_18 [2] : vector<8x8x8xf32> to vector<8x8xf32>
    %41 = vector.shape_cast %40 : vector<8x8xf32> to vector<8x8x1xf32>
    %42 = vector.broadcast %41 : vector<8x8x1xf32> to vector<8x8x8xf32>
    %43 = arith.subf %39, %42 : vector<8x8x8xf32>
    %44 = math.exp %43 : vector<8x8x8xf32>
    %cst_19 = arith.constant dense<0.000000e+00> : vector<8x8xf32>
    %45 = vector.multi_reduction <add>, %44, %cst_19 [2] : vector<8x8x8xf32> to vector<8x8xf32>
    %46 = vector.shape_cast %45 : vector<8x8xf32> to vector<8x8x1xf32>
    %47 = tpu.reciprocal %46 : vector<8x8x1xf32> -> vector<8x8x1xf32>
    %48 = vector.broadcast %47 : vector<8x8x1xf32> to vector<8x8x8xf32>
    %49 = arith.mulf %44, %48 : vector<8x8x8xf32>
    "tpu.trace_start"() <{level = 10 : i32, message = "bqk,bkd->bqd"}> : () -> ()
    %cst_20 = arith.constant dense<0.000000e+00> : vector<8x8x8xf32>
    %50 = tpu.matmul %49, %37, %cst_20 {dimension_numbers = #tpu.dot_dimension_numbers<[2], [1], [1], [2], [0, 0, 0, 1, 1, 2], [0], [0]>} : vector<8x8x8xf32>, vector<8x8x8xf32>, vector<8x8x8xf32> -> vector<8x8x8xf32>
    "tpu.trace_stop"() : () -> ()
    %51 = vector.shape_cast %50 : vector<8x8x8xf32> to vector<64x8xf32>
    %52 = vector.extract_strided_slice %51 {offsets = [0, 0], sizes = [16, 8], strides = [1, 1]} : vector<64x8xf32> to vector<16x8xf32>
    %53 = vector.extract_strided_slice %51 {offsets = [16, 0], sizes = [16, 8], strides = [1, 1]} : vector<64x8xf32> to vector<16x8xf32>
    %54 = vector.extract_strided_slice %51 {offsets = [32, 0], sizes = [16, 8], strides = [1, 1]} : vector<64x8xf32> to vector<16x8xf32>
    %55 = vector.extract_strided_slice %51 {offsets = [48, 0], sizes = [16, 8], strides = [1, 1]} : vector<64x8xf32> to vector<16x8xf32>
    %56 = tpu.concatenate %52, %53, %54, %55 in 1 : vector<16x8xf32>, vector<16x8xf32>, vector<16x8xf32>, vector<16x8xf32> -> vector<16x32xf32>
    %cst_21 = arith.constant dense<0.000000e+00> : vector<16x32xf32>
    %57 = tpu.matmul %56, %1, %cst_21 {dimension_numbers = #tpu.dot_dimension_numbers<[1], [0], [0], [1], [0, 0, 1, 1], [], []>} : vector<16x32xf32>, vector<32x32xf32>, vector<16x32xf32> -> vector<16x32xf32>
    %58 = vector.broadcast %5 : vector<1x32xf32> to vector<16x32xf32>
    %59 = arith.addf %57, %58 : vector<16x32xf32>
    %60 = arith.addf %16, %59 : vector<16x32xf32>
    %cst_22 = arith.constant dense<0.000000e+00> : vector<16xf32>
    %61 = vector.multi_reduction <add>, %60, %cst_22 [1] : vector<16x32xf32> to vector<16xf32>
    %62 = vector.shape_cast %61 : vector<16xf32> to vector<16x1xf32>
    %cst_23 = arith.constant 3.200000e+01 : f32
    %63 = vector.broadcast %cst_23 : f32 to vector<16x1xf32>
    %64 = arith.divf %62, %63 : vector<16x1xf32>
    %65 = vector.broadcast %64 : vector<16x1xf32> to vector<16x32xf32>
    %66 = arith.subf %60, %65 : vector<16x32xf32>
    %67 = arith.mulf %66, %66 : vector<16x32xf32>
    %cst_24 = arith.constant dense<0.000000e+00> : vector<16xf32>
    %68 = vector.multi_reduction <add>, %67, %cst_24 [1] : vector<16x32xf32> to vector<16xf32>
    %69 = vector.shape_cast %68 : vector<16xf32> to vector<16x1xf32>
    %cst_25 = arith.constant 3.200000e+01 : f32
    %70 = vector.broadcast %cst_25 : f32 to vector<16x1xf32>
    %71 = arith.divf %69, %70 : vector<16x1xf32>
    %72 = vector.broadcast %64 : vector<16x1xf32> to vector<16x32xf32>
    %73 = arith.subf %60, %72 : vector<16x32xf32>
    %cst_26 = arith.constant 9.99999974E-6 : f32
    %74 = vector.broadcast %cst_26 : f32 to vector<16x1xf32>
    %75 = arith.addf %71, %74 : vector<16x1xf32>
    %76 = math.rsqrt %75 : vector<16x1xf32>
    %77 = vector.broadcast %76 : vector<16x1xf32> to vector<16x32xf32>
    %78 = arith.mulf %73, %77 : vector<16x32xf32>
    %79 = vector.broadcast %8 : vector<1x32xf32> to vector<16x32xf32>
    %80 = arith.mulf %78, %79 : vector<16x32xf32>
    %81 = vector.broadcast %9 : vector<1x32xf32> to vector<16x32xf32>
    %82 = arith.addf %80, %81 : vector<16x32xf32>
    %cst_27 = arith.constant dense<0.000000e+00> : vector<16x64xf32>
    %83 = tpu.matmul %82, %2, %cst_27 {dimension_numbers = #tpu.dot_dimension_numbers<[1], [0], [0], [1], [0, 0, 1, 1], [], []>} : vector<16x32xf32>, vector<32x64xf32>, vector<16x64xf32> -> vector<16x64xf32>
    %84 = vector.broadcast %6 : vector<1x64xf32> to vector<16x64xf32>
    %85 = arith.addf %83, %84 : vector<16x64xf32>
    %cst_28 = arith.constant 0.000000e+00 : f32
    %86 = vector.broadcast %cst_28 : f32 to vector<16x64xf32>
    %87 = arith.maximumf %85, %86 : vector<16x64xf32>
    %cst_29 = arith.constant dense<0.000000e+00> : vector<16x32xf32>
    %88 = tpu.matmul %87, %3, %cst_29 {dimension_numbers = #tpu.dot_dimension_numbers<[1], [0], [0], [1], [0, 0, 1, 1], [], []>} : vector<16x64xf32>, vector<64x32xf32>, vector<16x32xf32> -> vector<16x32xf32>
    %89 = vector.broadcast %7 : vector<1x32xf32> to vector<16x32xf32>
    %90 = arith.addf %88, %89 : vector<16x32xf32>
    %91 = arith.addf %82, %90 : vector<16x32xf32>
    %cst_30 = arith.constant dense<0.000000e+00> : vector<16xf32>
    %92 = vector.multi_reduction <add>, %91, %cst_30 [1] : vector<16x32xf32> to vector<16xf32>
    %93 = vector.shape_cast %92 : vector<16xf32> to vector<16x1xf32>
    %cst_31 = arith.constant 3.200000e+01 : f32
    %94 = vector.broadcast %cst_31 : f32 to vector<16x1xf32>
    %95 = arith.divf %93, %94 : vector<16x1xf32>
    %96 = vector.broadcast %95 : vector<16x1xf32> to vector<16x32xf32>
    %97 = arith.subf %91, %96 : vector<16x32xf32>
    %98 = arith.mulf %97, %97 : vector<16x32xf32>
    %cst_32 = arith.constant dense<0.000000e+00> : vector<16xf32>
    %99 = vector.multi_reduction <add>, %98, %cst_32 [1] : vector<16x32xf32> to vector<16xf32>
    %100 = vector.shape_cast %99 : vector<16xf32> to vector<16x1xf32>
    %cst_33 = arith.constant 3.200000e+01 : f32
    %101 = vector.broadcast %cst_33 : f32 to vector<16x1xf32>
    %102 = arith.divf %100, %101 : vector<16x1xf32>
    %103 = vector.broadcast %95 : vector<16x1xf32> to vector<16x32xf32>
    %104 = arith.subf %91, %103 : vector<16x32xf32>
    %cst_34 = arith.constant 9.99999974E-6 : f32
    %105 = vector.broadcast %cst_34 : f32 to vector<16x1xf32>
    %106 = arith.addf %102, %105 : vector<16x1xf32>
    %107 = math.rsqrt %106 : vector<16x1xf32>
    %108 = vector.broadcast %107 : vector<16x1xf32> to vector<16x32xf32>
    %109 = arith.mulf %104, %108 : vector<16x32xf32>
    %110 = vector.broadcast %10 : vector<1x32xf32> to vector<16x32xf32>
    %111 = arith.mulf %109, %110 : vector<16x32xf32>
    %112 = vector.broadcast %11 : vector<1x32xf32> to vector<16x32xf32>
    %113 = arith.addf %111, %112 : vector<16x32xf32>
    %cst_35 = arith.constant dense<0.000000e+00> : vector<16x96xf32>
    %114 = tpu.matmul %113, %0, %cst_35 {dimension_numbers = #tpu.dot_dimension_numbers<[1], [0], [0], [1], [0, 0, 1, 1], [], []>} : vector<16x32xf32>, vector<32x96xf32>, vector<16x96xf32> -> vector<16x96xf32>
    %115 = vector.broadcast %4 : vector<1x96xf32> to vector<16x96xf32>
    %116 = arith.addf %114, %115 : vector<16x96xf32>
    %117 = vector.extract_strided_slice %116 {offsets = [0, 0], sizes = [16, 8], strides = [1, 1]} : vector<16x96xf32> to vector<16x8xf32>
    %118 = vector.extract_strided_slice %116 {offsets = [0, 8], sizes = [16, 8], strides = [1, 1]} : vector<16x96xf32> to vector<16x8xf32>
    %119 = vector.extract_strided_slice %116 {offsets = [0, 16], sizes = [16, 8], strides = [1, 1]} : vector<16x96xf32> to vector<16x8xf32>
    %120 = vector.extract_strided_slice %116 {offsets = [0, 24], sizes = [16, 8], strides = [1, 1]} : vector<16x96xf32> to vector<16x8xf32>
    %121 = tpu.concatenate %117, %118, %119, %120 in 0 : vector<16x8xf32>, vector<16x8xf32>, vector<16x8xf32>, vector<16x8xf32> -> vector<64x8xf32>
    %122 = vector.shape_cast %121 : vector<64x8xf32> to vector<8x8x8xf32>
    %123 = vector.extract_strided_slice %116 {offsets = [0, 32], sizes = [16, 8], strides = [1, 1]} : vector<16x96xf32> to vector<16x8xf32>
    %124 = vector.extract_strided_slice %116 {offsets = [0, 40], sizes = [16, 8], strides = [1, 1]} : vector<16x96xf32> to vector<16x8xf32>
    %125 = vector.extract_strided_slice %116 {offsets = [0, 48], sizes = [16, 8], strides = [1, 1]} : vector<16x96xf32> to vector<16x8xf32>
    %126 = vector.extract_strided_slice %116 {offsets = [0, 56], sizes = [16, 8], strides = [1, 1]} : vector<16x96xf32> to vector<16x8xf32>
    %127 = tpu.concatenate %123, %124, %125, %126 in 0 : vector<16x8xf32>, vector<16x8xf32>, vector<16x8xf32>, vector<16x8xf32> -> vector<64x8xf32>
    %128 = vector.shape_cast %127 : vector<64x8xf32> to vector<8x8x8xf32>
    %129 = vector.extract_strided_slice %116 {offsets = [0, 64], sizes = [16, 8], strides = [1, 1]} : vector<16x96xf32> to vector<16x8xf32>
    %130 = vector.extract_strided_slice %116 {offsets = [0, 72], sizes = [16, 8], strides = [1, 1]} : vector<16x96xf32> to vector<16x8xf32>
    %131 = vector.extract_strided_slice %116 {offsets = [0, 80], sizes = [16, 8], strides = [1, 1]} : vector<16x96xf32> to vector<16x8xf32>
    %132 = vector.extract_strided_slice %116 {offsets = [0, 88], sizes = [16, 8], strides = [1, 1]} : vector<16x96xf32> to vector<16x8xf32>
    %133 = tpu.concatenate %129, %130, %131, %132 in 0 : vector<16x8xf32>, vector<16x8xf32>, vector<16x8xf32>, vector<16x8xf32> -> vector<64x8xf32>
    %134 = vector.shape_cast %133 : vector<64x8xf32> to vector<8x8x8xf32>
    "tpu.trace_start"() <{level = 10 : i32, message = "bqd,bkd->bqk"}> : () -> ()
    %cst_36 = arith.constant dense<0.000000e+00> : vector<8x8x8xf32>
    %135 = tpu.matmul %122, %128, %cst_36 {dimension_numbers = #tpu.dot_dimension_numbers<[2], [2], [1], [1], [0, 0, 0, 1, 1, 1], [0], [0]>} : vector<8x8x8xf32>, vector<8x8x8xf32>, vector<8x8x8xf32> -> vector<8x8x8xf32>
    "tpu.trace_stop"() : () -> ()
    %136 = arith.addf %135, %15 : vector<8x8x8xf32>
    %cst_37 = arith.constant dense<0xFF800000> : vector<8x8xf32>
    %137 = vector.multi_reduction <maximumf>, %136, %cst_37 [2] : vector<8x8x8xf32> to vector<8x8xf32>
    %138 = vector.shape_cast %137 : vector<8x8xf32> to vector<8x8x1xf32>
    %139 = vector.broadcast %138 : vector<8x8x1xf32> to vector<8x8x8xf32>
    %140 = arith.subf %136, %139 : vector<8x8x8xf32>
    %141 = math.exp %140 : vector<8x8x8xf32>
    %cst_38 = arith.constant dense<0.000000e+00> : vector<8x8xf32>
    %142 = vector.multi_reduction <add>, %141, %cst_38 [2] : vector<8x8x8xf32> to vector<8x8xf32>
    %143 = vector.shape_cast %142 : vector<8x8xf32> to vector<8x8x1xf32>
    %144 = tpu.reciprocal %143 : vector<8x8x1xf32> -> vector<8x8x1xf32>
    %145 = vector.broadcast %144 : vector<8x8x1xf32> to vector<8x8x8xf32>
    %146 = arith.mulf %141, %145 : vector<8x8x8xf32>
    "tpu.trace_start"() <{level = 10 : i32, message = "bqk,bkd->bqd"}> : () -> ()
    %cst_39 = arith.constant dense<0.000000e+00> : vector<8x8x8xf32>
    %147 = tpu.matmul %146, %134, %cst_39 {dimension_numbers = #tpu.dot_dimension_numbers<[2], [1], [1], [2], [0, 0, 0, 1, 1, 2], [0], [0]>} : vector<8x8x8xf32>, vector<8x8x8xf32>, vector<8x8x8xf32> -> vector<8x8x8xf32>
    "tpu.trace_stop"() : () -> ()
    %148 = vector.shape_cast %147 : vector<8x8x8xf32> to vector<64x8xf32>
    %149 = vector.extract_strided_slice %148 {offsets = [0, 0], sizes = [16, 8], strides = [1, 1]} : vector<64x8xf32> to vector<16x8xf32>
    %150 = vector.extract_strided_slice %148 {offsets = [16, 0], sizes = [16, 8], strides = [1, 1]} : vector<64x8xf32> to vector<16x8xf32>
    %151 = vector.extract_strided_slice %148 {offsets = [32, 0], sizes = [16, 8], strides = [1, 1]} : vector<64x8xf32> to vector<16x8xf32>
    %152 = vector.extract_strided_slice %148 {offsets = [48, 0], sizes = [16, 8], strides = [1, 1]} : vector<64x8xf32> to vector<16x8xf32>
    %153 = tpu.concatenate %149, %150, %151, %152 in 1 : vector<16x8xf32>, vector<16x8xf32>, vector<16x8xf32>, vector<16x8xf32> -> vector<16x32xf32>
    %cst_40 = arith.constant dense<0.000000e+00> : vector<16x32xf32>
    %154 = tpu.matmul %153, %1, %cst_40 {dimension_numbers = #tpu.dot_dimension_numbers<[1], [0], [0], [1], [0, 0, 1, 1], [], []>} : vector<16x32xf32>, vector<32x32xf32>, vector<16x32xf32> -> vector<16x32xf32>
    %155 = vector.broadcast %5 : vector<1x32xf32> to vector<16x32xf32>
    %156 = arith.addf %154, %155 : vector<16x32xf32>
    %157 = arith.addf %113, %156 : vector<16x32xf32>
    %cst_41 = arith.constant dense<0.000000e+00> : vector<16xf32>
    %158 = vector.multi_reduction <add>, %157, %cst_41 [1] : vector<16x32xf32> to vector<16xf32>
    %159 = vector.shape_cast %158 : vector<16xf32> to vector<16x1xf32>
    %cst_42 = arith.constant 3.200000e+01 : f32
    %160 = vector.broadcast %cst_42 : f32 to vector<16x1xf32>
    %161 = arith.divf %159, %160 : vector<16x1xf32>
    %162 = vector.broadcast %161 : vector<16x1xf32> to vector<16x32xf32>
    %163 = arith.subf %157, %162 : vector<16x32xf32>
    %164 = arith.mulf %163, %163 : vector<16x32xf32>
    %cst_43 = arith.constant dense<0.000000e+00> : vector<16xf32>
    %165 = vector.multi_reduction <add>, %164, %cst_43 [1] : vector<16x32xf32> to vector<16xf32>
    %166 = vector.shape_cast %165 : vector<16xf32> to vector<16x1xf32>
    %cst_44 = arith.constant 3.200000e+01 : f32
    %167 = vector.broadcast %cst_44 : f32 to vector<16x1xf32>
    %168 = arith.divf %166, %167 : vector<16x1xf32>
    %169 = vector.broadcast %161 : vector<16x1xf32> to vector<16x32xf32>
    %170 = arith.subf %157, %169 : vector<16x32xf32>
    %cst_45 = arith.constant 9.99999974E-6 : f32
    %171 = vector.broadcast %cst_45 : f32 to vector<16x1xf32>
    %172 = arith.addf %168, %171 : vector<16x1xf32>
    %173 = math.rsqrt %172 : vector<16x1xf32>
    %174 = vector.broadcast %173 : vector<16x1xf32> to vector<16x32xf32>
    %175 = arith.mulf %170, %174 : vector<16x32xf32>
    %176 = vector.broadcast %8 : vector<1x32xf32> to vector<16x32xf32>
    %177 = arith.mulf %175, %176 : vector<16x32xf32>
    %178 = vector.broadcast %9 : vector<1x32xf32> to vector<16x32xf32>
    %179 = arith.addf %177, %178 : vector<16x32xf32>
    %cst_46 = arith.constant dense<0.000000e+00> : vector<16x64xf32>
    %180 = tpu.matmul %179, %2, %cst_46 {dimension_numbers = #tpu.dot_dimension_numbers<[1], [0], [0], [1], [0, 0, 1, 1], [], []>} : vector<16x32xf32>, vector<32x64xf32>, vector<16x64xf32> -> vector<16x64xf32>
    %181 = vector.broadcast %6 : vector<1x64xf32> to vector<16x64xf32>
    %182 = arith.addf %180, %181 : vector<16x64xf32>
    %cst_47 = arith.constant 0.000000e+00 : f32
    %183 = vector.broadcast %cst_47 : f32 to vector<16x64xf32>
    %184 = arith.maximumf %182, %183 : vector<16x64xf32>
    %cst_48 = arith.constant dense<0.000000e+00> : vector<16x32xf32>
    %185 = tpu.matmul %184, %3, %cst_48 {dimension_numbers = #tpu.dot_dimension_numbers<[1], [0], [0], [1], [0, 0, 1, 1], [], []>} : vector<16x64xf32>, vector<64x32xf32>, vector<16x32xf32> -> vector<16x32xf32>
    %186 = vector.broadcast %7 : vector<1x32xf32> to vector<16x32xf32>
    %187 = arith.addf %185, %186 : vector<16x32xf32>
    %188 = arith.addf %179, %187 : vector<16x32xf32>
    %cst_49 = arith.constant dense<0.000000e+00> : vector<16xf32>
    %189 = vector.multi_reduction <add>, %188, %cst_49 [1] : vector<16x32xf32> to vector<16xf32>
    %190 = vector.shape_cast %189 : vector<16xf32> to vector<16x1xf32>
    %cst_50 = arith.constant 3.200000e+01 : f32
    %191 = vector.broadcast %cst_50 : f32 to vector<16x1xf32>
    %192 = arith.divf %190, %191 : vector<16x1xf32>
    %193 = vector.broadcast %192 : vector<16x1xf32> to vector<16x32xf32>
    %194 = arith.subf %188, %193 : vector<16x32xf32>
    %195 = arith.mulf %194, %194 : vector<16x32xf32>
    %cst_51 = arith.constant dense<0.000000e+00> : vector<16xf32>
    %196 = vector.multi_reduction <add>, %195, %cst_51 [1] : vector<16x32xf32> to vector<16xf32>
    %197 = vector.shape_cast %196 : vector<16xf32> to vector<16x1xf32>
    %cst_52 = arith.constant 3.200000e+01 : f32
    %198 = vector.broadcast %cst_52 : f32 to vector<16x1xf32>
    %199 = arith.divf %197, %198 : vector<16x1xf32>
    %200 = vector.broadcast %192 : vector<16x1xf32> to vector<16x32xf32>
    %201 = arith.subf %188, %200 : vector<16x32xf32>
    %cst_53 = arith.constant 9.99999974E-6 : f32
    %202 = vector.broadcast %cst_53 : f32 to vector<16x1xf32>
    %203 = arith.addf %199, %202 : vector<16x1xf32>
    %204 = math.rsqrt %203 : vector<16x1xf32>
    %205 = vector.broadcast %204 : vector<16x1xf32> to vector<16x32xf32>
    %206 = arith.mulf %201, %205 : vector<16x32xf32>
    %207 = vector.broadcast %10 : vector<1x32xf32> to vector<16x32xf32>
    %208 = arith.mulf %206, %207 : vector<16x32xf32>
    %209 = vector.broadcast %11 : vector<1x32xf32> to vector<16x32xf32>
    %210 = arith.addf %208, %209 : vector<16x32xf32>
    %cst_54 = arith.constant dense<0.000000e+00> : vector<16xf32>
    %211 = vector.multi_reduction <add>, %210, %cst_54 [1] : vector<16x32xf32> to vector<16xf32>
    %212 = vector.shape_cast %211 : vector<16xf32> to vector<16x1xf32>
    %cst_55 = arith.constant 3.200000e+01 : f32
    %213 = vector.broadcast %cst_55 : f32 to vector<16x1xf32>
    %214 = arith.divf %212, %213 : vector<16x1xf32>
    %215 = vector.broadcast %214 : vector<16x1xf32> to vector<16x32xf32>
    %216 = arith.subf %210, %215 : vector<16x32xf32>
    %217 = arith.mulf %216, %216 : vector<16x32xf32>
    %cst_56 = arith.constant dense<0.000000e+00> : vector<16xf32>
    %218 = vector.multi_reduction <add>, %217, %cst_56 [1] : vector<16x32xf32> to vector<16xf32>
    %219 = vector.shape_cast %218 : vector<16xf32> to vector<16x1xf32>
    %cst_57 = arith.constant 3.200000e+01 : f32
    %220 = vector.broadcast %cst_57 : f32 to vector<16x1xf32>
    %221 = arith.divf %219, %220 : vector<16x1xf32>
    %222 = vector.broadcast %214 : vector<16x1xf32> to vector<16x32xf32>
    %223 = arith.subf %210, %222 : vector<16x32xf32>
    %cst_58 = arith.constant 9.99999974E-6 : f32
    %224 = vector.broadcast %cst_58 : f32 to vector<16x1xf32>
    %225 = arith.addf %221, %224 : vector<16x1xf32>
    %226 = math.rsqrt %225 : vector<16x1xf32>
    %227 = vector.broadcast %226 : vector<16x1xf32> to vector<16x32xf32>
    %228 = arith.mulf %223, %227 : vector<16x32xf32>
    %229 = vector.broadcast %12 : vector<1x32xf32> to vector<16x32xf32>
    %230 = arith.mulf %228, %229 : vector<16x32xf32>
    %231 = vector.broadcast %13 : vector<1x32xf32> to vector<16x32xf32>
    %232 = arith.addf %230, %231 : vector<16x32xf32>
    %c0_59 = arith.constant 0 : index
    %c0_60 = arith.constant 0 : index
    %233 = vector.load %arg2[%c0_59, %c0_60] : memref<16x32xf32, #tpu.memory_space<vmem>>, vector<16x32xf32>
    tpu.vector_store %arg2[%c0_59, %c0_60], %232 {strides = array<i32>} : memref<16x32xf32, #tpu.memory_space<vmem>>, vector<16x32xf32>,
    return
  }
}

</mosaic_0001>

<bundles_post_ra>
// kernel: tpu_custom_call.1
= control target key start
LH: loop header
LB: loop body
LE: loop exit
PB: predicated region body
PF: predicated region fallthrough
CT: control target
= control target key end

     0   :  { %7 = vsyncpa [#allocation3], 0  ;;  %s2825_s0 = inlined_call_operand.hbm [shape: f32[16,32], index: 0, kind: input, shape index: {}]   ;;  %s2826_s1 = inlined_call_operand.hbm [shape: f32[240,128], index: 1, kind: input, shape index: {}]   ;;  %s2827_s2 = inlined_call_operand.hbm [shape: f32[16,32], index: 2, kind: output, shape index: {}]  }
   0x1   :  { %8 = vsyncpa [#allocation6], 0 }
   0x2   :  { %9 = vsyncpa [#allocation4], 0  ;;  %s14_s11 = sshll.u32 %s2825_s0, 4  ;;  %s2206_s12 = smov [#allocation2]   ;;  %s15_s11 = int_to_ptr.hbm [resolvable:$true] %s14_s11 }
   0x3   :  { %s16_s13 = sshll.u32 %s2206_s12, 4  ;;  %s27_s16 = sshll.u32 %s2826_s1, 4  ;;  %s17_s13 = int_to_ptr.vmem [resolvable:$true] %s16_s13  ;;  %s28_s16 = int_to_ptr.hbm [resolvable:$true] %s27_s16 }
   0x4   :  { %s2207_s17 = smov 128   ;;  %s2208_s18 = smov 8  }
   0x5   :  { %22 = dma.hbm_to_vmem [thread:$0]  %s15_s11, 256, %s17_s13, [#allocation3], %s2207_s17, %s2207_s17, %s2208_s18  }
   0x6   :  { %s2209_s19 = smov [#allocation5]  }
   0x7   :  { %s29_s20 = sshll.u32 %s2209_s19, 4  ;;  %s30_s20 = int_to_ptr.vmem [resolvable:$true] %s29_s20 }
   0x8   :  { %35 = dma.hbm_to_vmem [thread:$0]  %s28_s16, 3840, %s30_s20, [#allocation6], %s2207_s17, %s2207_s17, %s2208_s18  }
   0x9   :  { %2200 = dma.done.wait [#allocation3], 256  }
   0xa   :  { %2201 = vsyncadd [#allocation3], 4294967040 }
   0xb   :  { %2202 = dma.done.wait [#allocation6], 3840  }
   0xc   :  { %2203 = vsyncadd [#allocation6], 4294963456  ;;  %v2246_v0 = vld [vmem:[#allocation5 + $0x18] sm:$0xff]  ;;  %v2248_v1 = vld [vmem:[#allocation5 + $0x10] sm:$0xff]  ;;  %vm85_vm0 = vcmask 261120   ;;  %s2210_s0 = smov 104  }
   0xd   :  { %104 = vmatpush.msra.mxu0 %v2246_v0  ;;  %v2251_v2 = vld [vmem:[#allocation5 + $0x8] sm:$0xff]  ;;  %v2253_v3 = vld [vmem:[#allocation5] sm:$0xff]  ;;  %v2257_v4 = vld [vmem:[#allocation2] sm:$0xff]  ;;  %s2211_s1 = smov 120   ;;  %s2212_s21 = smov 112   ;;  %vm131_vm1 = vcmask 64512  }
   0xe   :  { %v2262_v5 = vld [vmem:[#allocation2 + $0x8] sm:$0xff]  ;;  %v2023_v6 = vld [vmem:[#allocation5 + $0xa0] ss:$0 sm:$0xff]  ;;  %s2213_s22 = smov 96   ;;  %v74_v25 = vld [vmem:[#allocation5 + $0xb0] sm:$0xff]  ;;  %s2214_s23 = smov 64  }
   0xf   :  { %105 = vmatpush.msra.mxu0 %v2248_v1  ;;  %v76_v30 = vld [vmem:[#allocation5 + $0xc0] sm:$0xff]  ;;  %v77_v34 = vld [vmem:[#allocation5 + $0xc8] sm:$0xff]  ;;  %v75_v38 = vld [vmem:[#allocation5 + $0xb8] sm:$0xff]  ;;  %s2215_s24 = smov 16   ;;  %s2216_s25 = smov 24  }
  0x10   :  { %v78_v39 = vld [vmem:[#allocation5 + $0xd0] sm:$0xff]  ;;  %v79_v45 = vld [vmem:[#allocation5 + $0xd8] sm:$0xff]  ;;  %v81_v46 = vld [vmem:[#allocation5 + $0xe8] sm:$0xff]  ;;  %s2218_s26 = smov [#allocation7]   ;;  %s1902_s30 = sshll.u32 %s2827_s2, 4  ;;  %s1903_s30 = int_to_ptr.hbm [resolvable:$true] %s1902_s30 }
  0x11   :  { %106 = vmatpush.msra.mxu0 %v2251_v2  ;;  %v2345_v58 = vld [vmem:[#allocation5 + $0xe0] sm:$0xff]  ;;  %s1900_s27 = sshll.u32 %s2218_s26, 4  ;;  %s1901_s27 = int_to_ptr.vmem [resolvable:$true] %s1900_s27 }
  0x13   :  { %107 = vmatpush.msra.mxu0 %v2253_v3 }
  0x14   :  { %1916 = vmatmul.msk.f32.vlgmr.msra.gmra.mxu0 %vm85_vm0, %v2257_v4 }
  0x1c   :  { %1917 = vmatmul.msk.f32.gmra.mxu0 %vm85_vm0, %v2262_v5 }
  0x91   :  { %v109_v7 = vpop.f32.mrf.mxu0 }
  0x92   :  { %v2266_v8 = vadd.f32 %v2023_v6, %v109_v7 }
  0x94   :  { %125 = vrot.lane.b32.xlu2 %v2266_v8, %s2210_s0  ;;  %117 = vrot.lane.b32.xlu0 %v2266_v8, %s2211_s1 }
  0x99   :  { %v112_v9 = vpop.f32.mrf.mxu0 }
  0x9a   :  { %v2272_v10 = vadd.f32 %v2023_v6, %v112_v9 }
  0x9c   :  { %119 = vrot.lane.b32.xlu1 %v2272_v10, %s2211_s1  ;;  %123 = vrot.lane.b32.xlu2 %v2272_v10, %s2212_s21 }
  0x9d   :  { %121 = vrot.lane.b32.xlu0 %v2266_v8, %s2212_s21 }
  0xa4   :  { %127 = vrot.lane.b32.xlu1 %v2272_v10, %s2210_s0 }
  0xa5   :  { %156 = vrot.lane.b32.xlu0 %v2272_v10, %s2213_s22 }
  0xac   :  { %129 = vrot.lane.b32.xlu1 %v2266_v8, %s2213_s22 }
  0xee   :  { %v2290_v12 = vpop.permute.xlu2 %125 }
  0xf6   :  { %v2300_v15 = vpop.permute.xlu2 %123 }
 0x106   :  { %v2286_v11 = vpop.permute.xlu0 %117 }
 0x107   :  { %182 = vrot.lane.b32.xlu2 %v2286_v11, %s2213_s22  ;;  %v1993_v62 = vpack.i.bf16 %v2286_v11, %v2266_v8 }
 0x10e   :  { %v2292_v13 = vpop.permute.xlu1 %119 }
 0x10f   :  { %v2294_v14 = vpop.permute.xlu0 %121  ;;  %208 = vrot.lane.b32.xlu1 %v2292_v13, %s2213_s22 }
 0x110   :  { %234 = vrot.lane.b32.xlu0 %v2294_v14, %s2213_s22  ;;  %v1998_v63 = vpack.i.bf16 %v2292_v13, %v2294_v14 }
 0x116   :  { %v2302_v16 = vpop.permute.xlu1 %127 }
 0x117   :  { %v157_v17 = vpop.permute.xlu0 %156  ;;  %260 = vrot.lane.b32.xlu1 %v2300_v15, %s2213_s22  ;;  %312 = vrot.lane.b32.xlu2 %v2302_v16, %s2213_s22 }
 0x118   :  { %286 = vrot.lane.b32.xlu0 %v2290_v12, %s2213_s22  ;;  %1920 = vmatpush.xpose.msk.msra.mxu3 %vm131_vm1, %v157_v17 }
 0x11b   :  { %1921 = vmatmul.msk.f32.vlgmr.msra.gmra.mxu3 %vm131_vm1, %v2272_v10 }
 0x11e   :  { %v130_v18 = vpop.permute.xlu1 %129 }
 0x11f   :  { %1918 = vmatpush.xpose.msk.msra.mxu1 %vm131_vm1, %v130_v18 }
 0x122   :  { %1919 = vmatmul.msk.f32.vlgmr.msra.gmra.mxu1 %vm131_vm1, %v2266_v8 }
 0x161   :  { %v183_v19 = vpop.permute.xlu2 %182 }
 0x162   :  { %1922 = vmatpush.xpose.msk.msrb.mxu3 %vm131_vm1, %v183_v19 }
 0x165   :  { %1923 = vmatmul.msk.f32.vlgmr.msrb.gmra.mxu3 %vm131_vm1, %v2286_v11 }
 0x171   :  { %v313_v22 = vpop.permute.xlu2 %312 }
 0x181   :  { %v209_v20 = vpop.permute.xlu1 %208 }
 0x182   :  { %v235_v21 = vpop.permute.xlu0 %234  ;;  %1924 = vmatpush.xpose.msk.msrb.mxu1 %vm131_vm1, %v209_v20 }
 0x183   :  { %1926 = vmatpush.xpose.msk.msra.mxu2 %vm131_vm1, %v235_v21 }
 0x185   :  { %1925 = vmatmul.msk.f32.vlgmr.msrb.gmra.mxu1 %vm131_vm1, %v2292_v13 }
 0x186   :  { %1927 = vmatmul.msk.f32.vlgmr.msra.gmra.mxu2 %vm131_vm1, %v2294_v14 }
 0x187   :  { %1932 = vmatpush.xpose.msk.msrb.mxu2 %vm131_vm1, %v313_v22 }
 0x189   :  { %v261_v23 = vpop.permute.xlu1 %260 }
 0x18a   :  { %v287_v24 = vpop.permute.xlu0 %286  ;;  %1928 = vmatpush.xpose.msk.msra.mxu3 %vm131_vm1, %v261_v23 }
 0x18b   :  { %1930 = vmatpush.xpose.msk.msra.mxu1 %vm131_vm1, %v287_v24 }
 0x18d   :  { %1929 = vmatmul.msk.f32.vlgmr.msra.gmra.mxu3 %vm131_vm1, %v2300_v15 }
 0x18e   :  { %1931 = vmatmul.msk.f32.vlgmr.msra.gmra.mxu1 %vm131_vm1, %v2290_v12  ;;  %1933 = vmatmul.msk.f32.vlgmr.msrb.gmra.mxu2 %vm131_vm1, %v2302_v16 }
 0x19e   :  { %v179_v29 = vpop.f32.mrf.mxu3 }
 0x19f   :  { %v153_v26 = vpop.f32.mrf.mxu1  ;;  %v180_v40 = vadd.f32 %v179_v29, %v75_v38 }
 0x1a0   :  { %v154_v27 = vadd.f32 %v153_v26, %v74_v25 }
 0x1a1   :  { %v341_v44 = vsel %vm131_vm1, %v180_v40, -inf }
 0x1a2   :  { %v338_v28 = vsel %vm131_vm1, %v154_v27, -inf }
 0x1a3   :  { %339 = vmax.xlane.f32.xlu2 %v338_v28 }
 0x1e8   :  { %v205_v31 = vpop.f32.mrf.mxu3 }
 0x1e9   :  { %v206_v32 = vadd.f32 %v205_v31, %v76_v30 }
 0x1eb   :  { %v344_v33 = vsel %vm131_vm1, %v206_v32, -inf }
 0x1ec   :  { %345 = vmax.xlane.f32.xlu0 %v344_v33 }
 0x202   :  { %v231_v35 = vpop.f32.mrf.mxu1 }
 0x203   :  { %v232_v36 = vadd.f32 %v231_v35, %v77_v34 }
 0x205   :  { %v347_v37 = vsel %vm131_vm1, %v232_v36, -inf }
 0x206   :  { %348 = vmax.xlane.f32.xlu2 %v347_v37 }
 0x209   :  { %v257_v41 = vpop.f32.mrf.mxu2 }
 0x20a   :  { %v258_v42 = vadd.f32 %v257_v41, %v78_v39 }
 0x20b   :  { %v309_v59 = vpop.f32.mrf.mxu1 }
 0x20c   :  { %v350_v43 = vsel %vm131_vm1, %v258_v42, -inf  ;;  %v310_v60 = vadd.f32 %v309_v59, %v2345_v58 }
 0x20d   :  { %351 = vmax.xlane.f32.xlu1 %v350_v43 }
 0x20e   :  { %342 = vmax.xlane.f32.xlu2 %v341_v44  ;;  %v356_v61 = vsel %vm131_vm1, %v310_v60, -inf }
 0x210   :  { %v283_v47 = vpop.f32.mrf.mxu3 }
 0x211   :  { %v284_v48 = vadd.f32 %v283_v47, %v79_v45  ;;  %v335_v49 = vpop.f32.mrf.mxu2 }
 0x212   :  { %v336_v50 = vadd.f32 %v335_v49, %v81_v46 }
 0x213   :  { %v353_v52 = vsel %vm131_vm1, %v284_v48, -inf }
 0x214   :  { %v359_v51 = vsel %vm131_vm1, %v336_v50, -inf }
 0x215   :  { %360 = vmax.xlane.f32.xlu1 %v359_v51 }
 0x216   :  { %v340_v53 = vpop.xlane.xlu2 %339  ;;  %354 = vmax.xlane.f32.xlu2 %v353_v52 }
 0x217   :  { %v362_v54 = vsub.f32 %v154_v27, %v340_v53 }
 0x219   :  { %v370_v55 = vmul.f32 1.442695, %v362_v54 }
 0x21b   :  { %2033 = vpow2.f32 %v370_v55 }
 0x221   :  { %v2341_v56 = vpop.eup %2033 }
 0x222   :  { %v386_v57 = vsel %vm131_vm1, %v2341_v56, 0.0 }
 0x223   :  { %387 = vadd.xlane.f32.xlu0 %v386_v57 }
 0x22b   :  { %357 = vmax.xlane.f32.xlu0 %v356_v61 }
 0x22e   :  { %1994 = vrot.lane.b32.xlu1 %v1993_v62, %s2214_s23 }
 0x23f   :  { %1999 = vrot.lane.b32.xlu0 %v1998_v63, %s2214_s23 }
 0x25f   :  { %v346_v18 = vpop.xlane.xlu0 %345 }
 0x260   :  { %v364_v8 = vsub.f32 %v206_v32, %v346_v18 }
 0x262   :  { %v374_v14 = vmul.f32 1.442695, %v364_v8 }
 0x279   :  { %v349_v6 = vpop.xlane.xlu2 %348 }
 0x27a   :  { %v365_v7 = vsub.f32 %v232_v36, %v349_v6 }
 0x27c   :  { %v376_v9 = vmul.f32 1.442695, %v365_v7 }
 0x27e   :  { %2035 = vpow2.f32 %v376_v9 }
 0x280   :  { %v352_v17 = vpop.xlane.xlu1 %351 }
 0x281   :  { %v366_v19 = vsub.f32 %v258_v42, %v352_v17  ;;  %v343_v20 = vpop.xlane.xlu2 %342 }
 0x282   :  { %v363_v21 = vsub.f32 %v180_v40, %v343_v20 }
 0x283   :  { %v378_v22 = vmul.f32 1.442695, %v366_v19 }
 0x284   :  { %v2355_v23 = vpop.eup %2035  ;;  %v372_v11 = vmul.f32 1.442695, %v363_v21 }
 0x285   :  { %2037 = vpow2.f32 %v378_v22  ;;  %v395_v13 = vsel %vm131_vm1, %v2355_v23, 0.0 }
 0x286   :  { %2039 = vpow2.f32 %v372_v11  ;;  %396 = vadd.xlane.f32.xlu0 %v395_v13 }
 0x287   :  { %2041 = vpow2.f32 %v374_v14 }
 0x288   :  { %v361_v24 = vpop.xlane.xlu1 %360 }
 0x289   :  { %v369_v25 = vsub.f32 %v336_v50, %v361_v24  ;;  %v355_v26 = vpop.xlane.xlu2 %354 }
 0x28a   :  { %v367_v27 = vsub.f32 %v284_v48, %v355_v26 }
 0x28b   :  { %v2359_v28 = vpop.eup %2037  ;;  %v384_v29 = vmul.f32 1.442695, %v369_v25 }
 0x28c   :  { %v2361_v30 = vpop.eup %2039  ;;  %v380_v31 = vmul.f32 1.442695, %v367_v27  ;;  %v398_v32 = vsel %vm131_vm1, %v2359_v28, 0.0 }
 0x28d   :  { %2043 = vpow2.f32 %v384_v29  ;;  %399 = vadd.xlane.f32.xlu2 %v398_v32  ;;  %v389_v33 = vsel %vm131_vm1, %v2361_v30, 0.0  ;;  %v2367_v34 = vpop.eup %2041 }
 0x28e   :  { %2045 = vpow2.f32 %v380_v31  ;;  %390 = vadd.xlane.f32.xlu1 %v389_v33  ;;  %v392_v39 = vsel %vm131_vm1, %v2367_v34, 0.0 }
 0x293   :  { %v2369_v35 = vpop.eup %2043 }
 0x294   :  { %v2371_v36 = vpop.eup %2045  ;;  %v407_v37 = vsel %vm131_vm1, %v2369_v35, 0.0 }
 0x295   :  { %408 = vadd.xlane.f32.xlu0 %v407_v37  ;;  %v401_v38 = vsel %vm131_vm1, %v2371_v36, 0.0 }
 0x296   :  { %402 = vadd.xlane.f32.xlu2 %v401_v38  ;;  %393 = vadd.xlane.f32.xlu1 %v392_v39  ;;  %v388_v40 = vpop.xlane.xlu0 %387 }
 0x297   :  { %2047 = vrcp.f32 %v388_v40  ;;  %v421_v47 = vand.u32 2147483648, %v388_v40  ;;  %v419_v52 = vand.u32 2147483647, %v388_v40  ;;  %vm415_vm3 = vweird.f32 %v388_v40 }
 0x299   :  { %v422_v54 = vor.u32 1.1754944e-38, %v421_v47  ;;  %vm420_vm5 = vcmp.eq.f32.partialorder %v419_v52, 8.507059e+37 }
 0x29d   :  { %v2048_v41 = vpop.eup %2047 }
 0x29e   :  { %v411_v42 = vmul.f32 %v2048_v41, %v388_v40  ;;  %v358_v43 = vpop.xlane.xlu0 %357  ;;  %vm416_vm2 = vweird.f32 %v2048_v41 }
 0x29f   :  { %v368_v44 = vsub.f32 %v310_v60, %v358_v43  ;;  %vm417_vm4 = vmor %vm415_vm3, %vm416_vm2 }
 0x2a0   :  { %v412_v45 = vsub.f32 1.0, %v411_v42  ;;  %v1995_v46 = vpop.permute.xlu1 %1994 }
 0x2a1   :  { %v382_v48 = vmul.f32 1.442695, %v368_v44  ;;  %v1997_v49 = vunpack.i.h.bf16 %v1995_v46  ;;  %v1996_v50 = vunpack.i.l.bf16 %v1995_v46 }
 0x2a2   :  { %v413_v51 = vmul.f32 %v2048_v41, %v412_v45 }
 0x2a3   :  { %2049 = vpow2.f32 %v382_v48  ;;  %551 = vmatpush.msrb.mxu3 %v1996_v50  ;;  %603 = vmatpush.msrb.mxu1 %v1997_v49 }
 0x2a4   :  { %v414_v53 = vadd.f32 %v2048_v41, %v413_v51 }
 0x2a6   :  { %v418_v55 = vsel %vm417_vm4, %v2048_v41, %v414_v53 }
 0x2a7   :  { %v423_v57 = vsel %vm420_vm5, %v422_v54, %v418_v55 }
 0x2a8   :  { %v522_v59 = vmul.f32 %v2341_v56, %v423_v57  ;;  %v2003_v56 = vpack.i.bf16 %v2290_v12, %v2272_v10 }
 0x2a9   :  { %v2380_v60 = vpop.eup %2049  ;;  %660 = vrot.lane.b32.xlu0 %v2300_v15, %s2214_s23 }
 0x2aa   :  { %1934 = vmatmul.msk.f32.vlgmr.msrb.gmra.mxu3 %vm131_vm1, %v522_v59  ;;  %v404_v61 = vsel %vm131_vm1, %v2380_v60, 0.0 }
 0x2ab   :  { %405 = vadd.xlane.f32.xlu2 %v404_v61 }
 0x2af   :  { %712 = vrot.lane.b32.xlu1 %v2302_v16, %s2214_s23 }
 0x2b1   :  { %v2000_v62 = vpop.permute.xlu0 %1999 }
 0x2b2   :  { %v2002_v63 = vunpack.i.h.bf16 %v2000_v62  ;;  %v2001_v6 = vunpack.i.l.bf16 %v2000_v62 }
 0x2b4   :  { %629 = vmatpush.msra.mxu2 %v2002_v63  ;;  %655 = vmatpush.msra.mxu3 %v2001_v6 }
 0x2c3   :  { %2004 = vrot.lane.b32.xlu2 %v2003_v56, %s2214_s23 }
 0x2f9   :  { %v397_v15 = vpop.xlane.xlu0 %396 }
 0x2fa   :  { %2051 = vrcp.f32 %v397_v15  ;;  %v463_v20 = vand.u32 2147483648, %v397_v15  ;;  %vm457_vm7 = vweird.f32 %v397_v15  ;;  %v461_v8 = vand.u32 2147483647, %v397_v15 }
 0x2fc   :  { %v464_v13 = vor.u32 1.1754944e-38, %v463_v20  ;;  %vm462_vm9 = vcmp.eq.f32.partialorder %v461_v8, 8.507059e+37 }
 0x300   :  { %v2052_v7 = vpop.eup %2051  ;;  %v400_v9 = vpop.xlane.xlu2 %399 }
 0x301   :  { %v453_v17 = vmul.f32 %v2052_v7, %v397_v15  ;;  %2053 = vrcp.f32 %v400_v9  ;;  %v2392_v18 = vpop.xlane.xlu1 %390  ;;  %vm458_vm6 = vweird.f32 %v2052_v7  ;;  %v477_v25 = vand.u32 2147483648, %v400_v9 }
 0x302   :  { %vm459_vm8 = vmor %vm457_vm7, %vm458_vm6  ;;  %2055 = vrcp.f32 %v2392_v18  ;;  %v475_v29 = vand.u32 2147483647, %v400_v9  ;;  %vm471_vm11 = vweird.f32 %v400_v9  ;;  %v435_v20 = vand.u32 2147483648, %v2392_v18 }
 0x303   :  { %v454_v19 = vsub.f32 1.0, %v453_v17  ;;  %v478_v38 = vor.u32 1.1754944e-38, %v477_v25 }
 0x304   :  { %vm476_vm13 = vcmp.eq.f32.partialorder %v475_v29, 8.507059e+37 }
 0x305   :  { %v455_v16 = vmul.f32 %v2052_v7, %v454_v19 }
 0x307   :  { %v2054_v21 = vpop.eup %2053  ;;  %v456_v22 = vadd.f32 %v2052_v7, %v455_v16 }
 0x308   :  { %v467_v10 = vmul.f32 %v2054_v21, %v400_v9  ;;  %v409_v12 = vpop.xlane.xlu0 %408  ;;  %vm472_vm10 = vweird.f32 %v2054_v21  ;;  %v2395_v31 = vpop.eup %2055 }
 0x309   :  { %v460_v11 = vsel %vm459_vm8, %v2052_v7, %v456_v22  ;;  %2057 = vrcp.f32 %v409_v12  ;;  %v394_v24 = vpop.xlane.xlu1 %393  ;;  %v2397_v33 = vpop.xlane.xlu2 %402  ;;  %vm473_vm12 = vmor %vm471_vm11, %vm472_vm10  ;;  %v425_v43 = vmul.f32 %v2395_v31, %v2392_v18  ;;  %v519_v53 = vand.u32 2147483648, %v409_v12 }
 0x30a   :  { %v468_v14 = vsub.f32 1.0, %v467_v10  ;;  %v465_v26 = vsel %vm462_vm9, %v464_v13, %v460_v11  ;;  %2059 = vrcp.f32 %v394_v24  ;;  %v449_v52 = vand.u32 2147483648, %v394_v24 }
 0x30b   :  { %v525_v39 = vmul.f32 %v2355_v23, %v465_v26  ;;  %2061 = vrcp.f32 %v2397_v33  ;;  %v426_v23 = vsub.f32 1.0, %v425_v43  ;;  %v447_v55 = vand.u32 2147483647, %v394_v24 }
 0x30c   :  { %v469_v27 = vmul.f32 %v2054_v21, %v468_v14  ;;  %vm513_vm2 = vweird.f32 %v409_v12  ;;  %v517_v57 = vand.u32 2147483647, %v409_v12  ;;  %vm443_vm4 = vweird.f32 %v394_v24 }
 0x30d   :  { %1937 = vmatmul.msk.f32.vlgmr.msra.gmra.mxu2 %vm131_vm1, %v525_v39  ;;  %v450_v63 = vor.u32 1.1754944e-38, %v449_v52  ;;  %v520_v6 = vor.u32 1.1754944e-38, %v519_v53  ;;  %vm448_vm6 = vcmp.eq.f32.partialorder %v447_v55, 8.507059e+37  ;;  %vm430_vm7 = vweird.f32 %v2395_v31  ;;  %v2458_v52 = vld [vmem:[#allocation5 + $0x20] sm:$0xff] }
 0x30e   :  { %v470_v32 = vadd.f32 %v2054_v21, %v469_v27  ;;  %vm518_vm8 = vcmp.eq.f32.partialorder %v517_v57, 8.507059e+37  ;;  %vm429_vm9 = vweird.f32 %v2392_v18  ;;  %v489_v27 = vand.u32 2147483647, %v2397_v33 }
 0x30f   :  { %v2058_v37 = vpop.eup %2057  ;;  %vm431_vm10 = vmor %vm429_vm9, %vm430_vm7  ;;  %vm767_vm7 = vcmask 195584  }
 0x310   :  { %v474_v40 = vsel %vm473_vm12, %v2054_v21, %v470_v32  ;;  %v509_v41 = vmul.f32 %v2058_v37, %v409_v12  ;;  %v2060_v46 = vpop.eup %2059  ;;  %vm514_vm14 = vweird.f32 %v2058_v37  ;;  %v433_v21 = vand.u32 2147483647, %v2392_v18 }
 0x311   :  { %v479_v42 = vsel %vm476_vm13, %v478_v38, %v474_v40  ;;  %v439_v48 = vmul.f32 %v2060_v46, %v394_v24  ;;  %v2406_v50 = vpop.eup %2061  ;;  %vm444_vm15 = vweird.f32 %v2060_v46  ;;  %vm515_vm3 = vmor %vm513_vm2, %vm514_vm14  ;;  %vm485_vm13 = vweird.f32 %v2397_v33 }
 0x312   :  { %v510_v44 = vsub.f32 1.0, %v509_v41  ;;  %v526_v45 = vmul.f32 %v2359_v28, %v479_v42  ;;  %v427_v28 = vmul.f32 %v2395_v31, %v426_v23  ;;  %v481_v59 = vmul.f32 %v2406_v50, %v2397_v33  ;;  %vm445_vm5 = vmor %vm443_vm4, %vm444_vm15 }
 0x313   :  { %v440_v49 = vsub.f32 1.0, %v439_v48  ;;  %vm434_vm11 = vcmp.eq.f32.partialorder %v433_v21, 8.507059e+37  ;;  %vm486_vm12 = vweird.f32 %v2406_v50  ;;  %vm490_vm2 = vcmp.eq.f32.partialorder %v489_v27, 8.507059e+37 }
 0x314   :  { %v511_v47 = vmul.f32 %v2058_v37, %v510_v44  ;;  %1938 = vmatmul.msk.f32.vlgmr.msra.gmra.mxu3 %vm131_vm1, %v526_v45  ;;  %v428_v7 = vadd.f32 %v2395_v31, %v427_v28  ;;  %v482_v17 = vsub.f32 1.0, %v481_v59  ;;  %vm2431_vm14 = vmor %vm485_vm13, %vm486_vm12 }
 0x315   :  { %v441_v54 = vmul.f32 %v2060_v46, %v440_v49  ;;  %v2450_v49 = vld [vmem:[#allocation5 + $0x38] sm:$0xff] }
 0x316   :  { %v512_v51 = vadd.f32 %v2058_v37, %v511_v47  ;;  %v483_v10 = vmul.f32 %v2406_v50, %v482_v17  ;;  %v432_v12 = vsel %vm431_vm10, %v2395_v31, %v428_v7  ;;  %789 = vmatpush.msrb.mxu3 %v2450_v49  ;;  %v2024_v7 = vld [vmem:[#allocation5 + $0xa1] ss:$0 sm:$0xff] }
 0x317   :  { %v442_v61 = vadd.f32 %v2060_v46, %v441_v54 }
 0x318   :  { %v516_v62 = vsel %vm515_vm3, %v2058_v37, %v512_v51  ;;  %v484_v18 = vadd.f32 %v2406_v50, %v483_v10  ;;  %v2456_v51 = vld [vmem:[#allocation5 + $0x28] sm:$0xff]  ;;  %v2217_v10 = vmov 32.0  }
 0x319   :  { %v446_v56 = vsel %vm445_vm5, %v2060_v46, %v442_v61  ;;  %v521_v9 = vsel %vm518_vm8, %v520_v6, %v516_v62 }
 0x31a   :  { %v451_v15 = vsel %vm448_vm6, %v450_v63, %v446_v56  ;;  %v529_v8 = vmul.f32 %v2369_v35, %v521_v9  ;;  %v491_v35 = vand.u32 2147483648, %v2397_v33  ;;  %vm764_vm6 = vcmask 130048  }
 0x31b   :  { %v524_v19 = vmul.f32 %v2367_v34, %v451_v15  ;;  %v436_v34 = vor.u32 1.1754944e-38, %v435_v20  ;;  %v661_v37 = vpop.permute.xlu0 %660 }
 0x31d   :  { %1936 = vmatmul.msk.f32.vlgmr.msrb.gmra.mxu1 %vm131_vm1, %v524_v19  ;;  %v437_v13 = vsel %vm434_vm11, %v436_v34, %v432_v12 }
 0x31e   :  { %v406_v16 = vpop.xlane.xlu2 %405 }
 0x31f   :  { %2063 = vrcp.f32 %v406_v16  ;;  %v505_v32 = vand.u32 2147483648, %v406_v16  ;;  %v503_v33 = vand.u32 2147483647, %v406_v16  ;;  %vm499_vm3 = vweird.f32 %v406_v16 }
 0x320   :  { %2065 = vrcp.f32 %v2217_v10 }
 0x321   :  { %v713_v22 = vpop.permute.xlu1 %712  ;;  %v506_v40 = vor.u32 1.1754944e-38, %v505_v32  ;;  %vm504_vm5 = vcmp.eq.f32.partialorder %v503_v33, 8.507059e+37  ;;  %v2480_v32 = vld [vmem:[#allocation5 + $0x58] sm:$0xff] }
 0x322   :  { %733 = vmatpush.msrb.mxu2 %v713_v22 }
 0x323   :  { %1941 = vmatmul.msk.f32.vlgmr.msrb.gmra.mxu2 %vm131_vm1, %v529_v8 }
 0x324   :  { %992 = vmatpush.msra.mxu2 %v2246_v0  ;;  %v523_v0 = vmul.f32 %v2361_v30, %v437_v13 }
 0x325   :  { %v2064_v11 = vpop.eup %2063 }
 0x326   :  { %v495_v14 = vmul.f32 %v2064_v11, %v406_v16  ;;  %v2005_v24 = vpop.permute.xlu2 %2004  ;;  %993 = vmatpush.msra.mxu2 %v2248_v1  ;;  %v488_v1 = vsel %vm2431_vm14, %v2406_v50, %v484_v18  ;;  %vm500_vm15 = vweird.f32 %v2064_v11  ;;  %v2452_v50 = vld [vmem:[#allocation5 + $0x30] sm:$0xff]  ;;  %v2066_v12 = vpop.eup %2065 }
 0x327   :  { %v2007_v25 = vunpack.i.h.bf16 %v2005_v24  ;;  %v2006_v26 = vunpack.i.l.bf16 %v2005_v24  ;;  %vm501_vm4 = vmor %vm499_vm3, %vm500_vm15  ;;  %790 = vmatpush.msrb.mxu3 %v2452_v50  ;;  %v809_v34 = vmul.f32 32.0, %v2066_v12  ;;  %vm813_vm8 = vweird.f32 %v2066_v12 }
 0x328   :  { %v496_v29 = vsub.f32 1.0, %v495_v14  ;;  %994 = vmatpush.msra.mxu2 %v2251_v2  ;;  %v492_v2 = vor.u32 1.1754944e-38, %v491_v35  ;;  %vm892_vm15 = vcmask 523264  }
 0x329   :  { %577 = vmatpush.msrb.mxu0 %v2006_v26  ;;  %707 = vmatpush.msra.mxu1 %v2007_v25 }
 0x32a   :  { %v497_v38 = vmul.f32 %v2064_v11, %v496_v29  ;;  %1935 = vmatmul.msk.f32.vlgmr.msrb.gmra.mxu0 %vm131_vm1, %v523_v0  ;;  %995 = vmatpush.msra.mxu2 %v2253_v3  ;;  %v493_v39 = vsel %vm490_vm2, %v492_v2, %v488_v1  ;;  %v2483_v1 = vld [vmem:[#allocation5 + $0x50] sm:$0xff] }
 0x32b   :  { %681 = vmatpush.msra.mxu0 %v661_v37  ;;  %v527_v43 = vmul.f32 %v2371_v36, %v493_v39  ;;  %791 = vmatpush.msrb.mxu3 %v2456_v51  ;;  %v2486_v37 = vld [vmem:[#allocation5 + $0x48] sm:$0xff] }
 0x32c   :  { %v498_v30 = vadd.f32 %v2064_v11, %v497_v38  ;;  %v2489_v38 = vld [vmem:[#allocation5 + $0x40] sm:$0xff] }
 0x32d   :  { %v553_v3 = vpop.f32.mrf.mxu3  ;;  %792 = vmatpush.msrb.mxu3 %v2458_v52  ;;  %878 = vmatpush.msrb.mxu0 %v2480_v32 }
 0x32e   :  { %v502_v41 = vsel %vm501_vm4, %v2064_v11, %v498_v30  ;;  %v810_v11 = vsub.f32 1.0, %v809_v34 }
 0x32f   :  { %v507_v42 = vsel %vm504_vm5, %v506_v40, %v502_v41  ;;  %879 = vmatpush.msrb.mxu0 %v2483_v1 }
 0x330   :  { %v528_v44 = vmul.f32 %v2380_v60, %v507_v42  ;;  %v811_v13 = vmul.f32 %v2066_v12, %v810_v11  ;;  %v2493_v42 = vld [vmem:[#allocation5 + $0x98] sm:$0xff] }
 0x331   :  { %880 = vmatpush.msrb.mxu0 %v2486_v37  ;;  %907 = vmatpush.msrb.mxu1 %v2493_v42 }
 0x332   :  { %1939 = vmatmul.msk.f32.vlgmr.msra.gmra.mxu0 %vm131_vm1, %v527_v43  ;;  %1940 = vmatmul.msk.f32.vlgmr.msra.gmra.mxu1 %vm131_vm1, %v528_v44  ;;  %v812_v18 = vadd.f32 %v2066_v12, %v811_v13  ;;  %v2495_v43 = vld [vmem:[#allocation5 + $0x90] sm:$0xff] }
 0x333   :  { %881 = vmatpush.msrb.mxu0 %v2489_v38  ;;  %908 = vmatpush.msrb.mxu1 %v2495_v43 }
 0x334   :  { %v2474_v14 = vsel %vm813_vm8, %v2066_v12, %v812_v18  ;;  %v2534_v18 = vld [vmem:[#allocation5 + $0xa3] ss:$0 sm:$0xff] }
 0x390   :  { %v631_v47 = vpop.f32.mrf.mxu2 }
 0x397   :  { %v657_v45 = vpop.f32.mrf.mxu3 }
 0x398   :  { %748 = vrot.lane.b32.xlu0 %v657_v45, %s2215_s24 }
 0x39a   :  { %v605_v46 = vpop.f32.mrf.mxu1 }
 0x39b   :  { %740 = vrot.lane.b32.xlu1 %v605_v46, %s2208_s18 }
 0x3a3   :  { %742 = vrot.lane.b32.xlu1 %v631_v47, %s2208_s18 }
 0x3a6   :  { %v735_v60 = vpop.f32.mrf.mxu2 }
 0x3a7   :  { %v579_v48 = vpop.f32.mrf.mxu0 }
 0x3af   :  { %v683_v23 = vpop.f32.mrf.mxu0  ;;  %v709_v36 = vpop.f32.mrf.mxu1 }
 0x3b0   :  { %756 = vrot.lane.b32.xlu2 %v709_v36, %s2216_s25  ;;  %750 = vrot.lane.b32.xlu0 %v683_v23, %s2215_s24 }
 0x3b8   :  { %758 = vrot.lane.b32.xlu2 %v735_v60, %s2216_s25  ;;  %v2505_v60 = vld [vmem:[#allocation5 + $0x78] sm:$0xff] }
 0x40a   :  { %v749_v54 = vpop.permute.xlu0 %748  ;;  %v757_v57 = vpop.permute.xlu2 %756 }
 0x40d   :  { %v741_v53 = vpop.permute.xlu1 %740 }
 0x40e   :  { %v762_v55 = vsel %vm131_vm1, %v553_v3, %v741_v53  ;;  %v2498_v3 = vld [vmem:[#allocation5 + $0x88] sm:$0xff]  ;;  %v2507_v53 = vld [vmem:[#allocation5 + $0xa4] ss:$0 sm:$0xff] }
 0x40f   :  { %v765_v28 = vsel %vm764_vm6, %v762_v55, %v749_v54  ;;  %909 = vmatpush.msrb.mxu1 %v2498_v3 }
 0x410   :  { %v768_v59 = vsel %vm767_vm7, %v765_v28, %v757_v57  ;;  %v2510_v57 = vld [vmem:[#allocation5 + $0xa5] ss:$0 sm:$0xff] }
 0x411   :  { %1942 = vmatmul.msk.f32.vlgmr.msrb.gmra.mxu3 %vm85_vm0, %v768_v59 }
 0x412   :  { %v759_v6 = vpop.permute.xlu2 %758 }
 0x415   :  { %v743_v61 = vpop.permute.xlu1 %742 }
 0x416   :  { %v763_v62 = vsel %vm131_vm1, %v579_v48, %v743_v61  ;;  %v2502_v48 = vld [vmem:[#allocation5 + $0x80] sm:$0xff] }
 0x417   :  { %910 = vmatpush.msrb.mxu1 %v2502_v48 }
 0x419   :  { %911 = vmatpush.msrb.mxu1 %v2505_v60 }
 0x422   :  { %v751_v63 = vpop.permute.xlu0 %750 }
 0x423   :  { %v766_v56 = vsel %vm764_vm6, %v763_v62, %v751_v63 }
 0x424   :  { %v769_v15 = vsel %vm767_vm7, %v766_v56, %v759_v6 }
 0x425   :  { %1943 = vmatmul.msk.f32.gmra.mxu3 %vm85_vm0, %v769_v15 }
 0x494   :  { %v794_v9 = vpop.f32.mrf.mxu3 }
 0x495   :  { %v795_v17 = vadd.f32 %v2024_v7, %v794_v9 }
 0x497   :  { %v800_v19 = vadd.f32 %v795_v17, %v2257_v4 }
 0x499   :  { %v802_v16 = vsel %vm85_vm0, %v800_v19, 0.0 }
 0x49a   :  { %803 = vadd.xlane.f32.xlu1 %v802_v16  ;;  %v2519_v16 = vld [vmem:[#allocation5 + $0x70] sm:$0xff] }
 0x49b   :  { %912 = vmatpush.msrb.mxu1 %v2519_v16 }
 0x4a8   :  { %v797_v20 = vpop.f32.mrf.mxu3 }
 0x4a9   :  { %v798_v21 = vadd.f32 %v2024_v7, %v797_v20  ;;  %v2522_v20 = vld [vmem:[#allocation5 + $0x68] sm:$0xff] }
 0x4aa   :  { %913 = vmatpush.msrb.mxu1 %v2522_v20 }
 0x4ab   :  { %v801_v22 = vadd.f32 %v798_v21, %v2262_v5  ;;  %v2524_v21 = vld [vmem:[#allocation5 + $0x60] sm:$0xff] }
 0x4ac   :  { %914 = vmatpush.msrb.mxu1 %v2524_v21 }
 0x4ad   :  { %v805_v8 = vsel %vm85_vm0, %v801_v22, 0.0 }
 0x4ae   :  { %806 = vadd.xlane.f32.xlu0 %v805_v8 }
 0x50d   :  { %v804_v4 = vpop.xlane.xlu1 %803 }
 0x50e   :  { %v815_v24 = vmul.f32 %v2474_v14, %v804_v4 }
 0x510   :  { %v817_v35 = vsub.f32 %v800_v19, %v815_v24 }
 0x512   :  { %v819_v25 = vmul.f32 %v817_v35, %v817_v35 }
 0x514   :  { %v821_v5 = vsel %vm85_vm0, %v819_v25, 0.0 }
 0x515   :  { %822 = vadd.xlane.f32.xlu2 %v821_v5 }
 0x521   :  { %v807_v26 = vpop.xlane.xlu0 %806 }
 0x522   :  { %v816_v27 = vmul.f32 %v2474_v14, %v807_v26 }
 0x524   :  { %v818_v29 = vsub.f32 %v801_v22, %v816_v27  ;;  %v2528_v22 = vld [vmem:[#allocation5 + $0xa2] ss:$0 sm:$0xff] }
 0x526   :  { %v820_v0 = vmul.f32 %v818_v29, %v818_v29 }
 0x528   :  { %v824_v31 = vsel %vm85_vm0, %v820_v0, 0.0 }
 0x529   :  { %825 = vadd.xlane.f32.xlu1 %v824_v31 }
 0x588   :  { %v823_v33 = vpop.xlane.xlu2 %822 }
 0x589   :  { %v827_v2 = vmul.f32 %v823_v33, %v2474_v14 }
 0x58b   :  { %v829_v30 = vadd.f32 1e-05, %v827_v2 }
 0x58d   :  { %2067 = vrsqrt.f32 %v829_v30  ;;  %vm837_vm10 = vweird.f32 %v829_v30 }
 0x593   :  { %v2068_v39 = vpop.eup %2067 }
 0x594   :  { %v832_v40 = vmul.f32 %v2068_v39, %v829_v30  ;;  %vm838_vm9 = vweird.f32 %v2068_v39 }
 0x595   :  { %vm839_vm11 = vmor %vm837_vm10, %vm838_vm9 }
 0x596   :  { %v833_v41 = vmul.f32 %v2068_v39, %v832_v40 }
 0x598   :  { %v834_v44 = vmul.f32 0.5, %v833_v41 }
 0x59a   :  { %v835_v46 = vsub.f32 1.5, %v834_v44 }
 0x59c   :  { %v826_v45 = vpop.xlane.xlu1 %825  ;;  %v836_v23 = vmul.f32 %v2068_v39, %v835_v46 }
 0x59d   :  { %v828_v47 = vmul.f32 %v826_v45, %v2474_v14 }
 0x59e   :  { %v840_v54 = vsel %vm839_vm11, %v2068_v39, %v836_v23 }
 0x59f   :  { %v830_v36 = vadd.f32 1e-05, %v828_v47  ;;  %v851_v55 = vmul.f32 %v840_v54, %v817_v35 }
 0x5a1   :  { %2069 = vrsqrt.f32 %v830_v36  ;;  %v854_v28 = vmul.f32 %v2507_v53, %v851_v55  ;;  %vm847_vm13 = vweird.f32 %v830_v36 }
 0x5a3   :  { %v857_v59 = vadd.f32 %v2510_v57, %v854_v28 }
 0x5a5   :  { %1944 = vmatmul.msk.f32.vlgmr.msrb.gmra.mxu0 %vm85_vm0, %v857_v59 }
 0x5a7   :  { %v2070_v61 = vpop.eup %2069 }
 0x5a8   :  { %v842_v62 = vmul.f32 %v2070_v61, %v830_v36  ;;  %vm848_vm12 = vweird.f32 %v2070_v61 }
 0x5a9   :  { %vm849_vm14 = vmor %vm847_vm13, %vm848_vm12 }
 0x5aa   :  { %v843_v63 = vmul.f32 %v2070_v61, %v842_v62 }
 0x5ac   :  { %v844_v6 = vmul.f32 0.5, %v843_v63 }
 0x5ae   :  { %v845_v56 = vsub.f32 1.5, %v844_v6 }
 0x5b0   :  { %v846_v15 = vmul.f32 %v2070_v61, %v845_v56  ;;  %v2546_v56 = vld [vmem:[#allocation5 + $0xa6] ss:$0 sm:$0xff] }
 0x5b2   :  { %v850_v7 = vsel %vm849_vm14, %v2070_v61, %v846_v15 }
 0x5b3   :  { %v852_v9 = vmul.f32 %v850_v7, %v818_v29 }
 0x5b5   :  { %v855_v17 = vmul.f32 %v2507_v53, %v852_v9  ;;  %v2548_v9 = vld [vmem:[#allocation5 + $0xa7] ss:$0 sm:$0xff] }
 0x5b7   :  { %v858_v19 = vadd.f32 %v2510_v57, %v855_v17 }
 0x5b9   :  { %1945 = vmatmul.msk.f32.gmra.mxu0 %vm85_vm0, %v858_v19 }
 0x622   :  { %v883_v8 = vpop.f32.mrf.mxu0 }
 0x623   :  { %v884_v10 = vadd.f32 %v2528_v22, %v883_v8 }
 0x625   :  { %v889_v12 = vmax.f32 %v884_v10, 0.0 }
 0x627   :  { %1946 = vmatmul.msk.f32.vlgmr.msrb.gmra.mxu1 %vm892_vm15, %v889_v12 }
 0x636   :  { %v886_v34 = vpop.f32.mrf.mxu0 }
 0x637   :  { %v887_v11 = vadd.f32 %v2528_v22, %v886_v34 }
 0x639   :  { %v890_v13 = vmax.f32 %v887_v11, 0.0 }
 0x63b   :  { %1947 = vmatmul.msk.f32.gmra.mxu1 %vm892_vm15, %v890_v13 }
 0x6a4   :  { %v916_v4 = vpop.f32.mrf.mxu1 }
 0x6a5   :  { %v917_v24 = vadd.f32 %v2534_v18, %v916_v4 }
 0x6a7   :  { %v922_v35 = vadd.f32 %v917_v24, %v857_v59 }
 0x6a9   :  { %v924_v25 = vsel %vm85_vm0, %v922_v35, 0.0 }
 0x6aa   :  { %925 = vadd.xlane.f32.xlu0 %v924_v25 }
 0x6b8   :  { %v919_v5 = vpop.f32.mrf.mxu1 }
 0x6b9   :  { %v920_v26 = vadd.f32 %v2534_v18, %v919_v5 }
 0x6bb   :  { %v923_v27 = vadd.f32 %v920_v26, %v858_v19  ;;  %v2119_v26 = vld [vmem:[#allocation5 + $0xa0] ss:$0 sm:$0xff] }
 0x6bd   :  { %v927_v29 = vsel %vm85_vm0, %v923_v27, 0.0 }
 0x6be   :  { %928 = vadd.xlane.f32.xlu2 %v927_v29 }
 0x71d   :  { %v926_v0 = vpop.xlane.xlu0 %925 }
 0x71e   :  { %v930_v31 = vmul.f32 %v926_v0, %v2474_v14 }
 0x720   :  { %v932_v33 = vsub.f32 %v922_v35, %v930_v31 }
 0x722   :  { %v934_v2 = vmul.f32 %v932_v33, %v932_v33 }
 0x724   :  { %v936_v30 = vsel %vm85_vm0, %v934_v2, 0.0 }
 0x725   :  { %937 = vadd.xlane.f32.xlu1 %v936_v30 }
 0x731   :  { %v929_v39 = vpop.xlane.xlu2 %928 }
 0x732   :  { %v931_v40 = vmul.f32 %v929_v39, %v2474_v14 }
 0x734   :  { %v933_v41 = vsub.f32 %v923_v27, %v931_v40 }
 0x736   :  { %v935_v44 = vmul.f32 %v933_v41, %v933_v41 }
 0x738   :  { %v939_v45 = vsel %vm85_vm0, %v935_v44, 0.0 }
 0x739   :  { %940 = vadd.xlane.f32.xlu0 %v939_v45 }
 0x798   :  { %v938_v46 = vpop.xlane.xlu1 %937 }
 0x799   :  { %v942_v47 = vmul.f32 %v938_v46, %v2474_v14 }
 0x79b   :  { %v944_v23 = vadd.f32 1e-05, %v942_v47 }
 0x79d   :  { %2071 = vrsqrt.f32 %v944_v23  ;;  %vm952_vm3 = vweird.f32 %v944_v23 }
 0x7a3   :  { %v2072_v36 = vpop.eup %2071 }
 0x7a4   :  { %v947_v54 = vmul.f32 %v2072_v36, %v944_v23  ;;  %vm953_vm2 = vweird.f32 %v2072_v36 }
 0x7a5   :  { %vm954_vm4 = vmor %vm952_vm3, %vm953_vm2 }
 0x7a6   :  { %v948_v55 = vmul.f32 %v2072_v36, %v947_v54  ;;  %v2120_v54 = vld [vmem:[#allocation5 + $0xb0] sm:$0xff] }
 0x7a8   :  { %v949_v28 = vmul.f32 0.5, %v948_v55 }
 0x7aa   :  { %v950_v61 = vsub.f32 1.5, %v949_v28 }
 0x7ac   :  { %v941_v59 = vpop.xlane.xlu0 %940  ;;  %v951_v63 = vmul.f32 %v2072_v36, %v950_v61 }
 0x7ad   :  { %v943_v62 = vmul.f32 %v941_v59, %v2474_v14 }
 0x7ae   :  { %v955_v15 = vsel %vm954_vm4, %v2072_v36, %v951_v63  ;;  %v2121_v63 = vld [vmem:[#allocation5 + $0xc0] sm:$0xff] }
 0x7af   :  { %v945_v6 = vadd.f32 1e-05, %v943_v62  ;;  %v966_v7 = vmul.f32 %v955_v15, %v932_v33 }
 0x7b1   :  { %2073 = vrsqrt.f32 %v945_v6  ;;  %v969_v17 = vmul.f32 %v2546_v56, %v966_v7  ;;  %vm962_vm8 = vweird.f32 %v945_v6  ;;  %v2122_v7 = vld [vmem:[#allocation5 + $0xb8] sm:$0xff] }
 0x7b3   :  { %v2552_v19 = vadd.f32 %v2548_v9, %v969_v17 }
 0x7b5   :  { %1948 = vmatmul.msk.f32.vlgmr.msra.gmra.mxu2 %vm85_vm0, %v2552_v19 }
 0x7b7   :  { %v2074_v8 = vpop.eup %2073 }
 0x7b8   :  { %v957_v10 = vmul.f32 %v2074_v8, %v945_v6  ;;  %vm963_vm5 = vweird.f32 %v2074_v8 }
 0x7b9   :  { %vm964_vm9 = vmor %vm962_vm8, %vm963_vm5 }
 0x7ba   :  { %v958_v12 = vmul.f32 %v2074_v8, %v957_v10 }
 0x7bc   :  { %v959_v34 = vmul.f32 0.5, %v958_v12 }
 0x7be   :  { %v960_v11 = vsub.f32 1.5, %v959_v34 }
 0x7c0   :  { %v961_v13 = vmul.f32 %v2074_v8, %v960_v11 }
 0x7c2   :  { %v965_v4 = vsel %vm964_vm9, %v2074_v8, %v961_v13  ;;  %v2123_v13 = vld [vmem:[#allocation5 + $0xd0] sm:$0xff] }
 0x7c3   :  { %v967_v24 = vmul.f32 %v965_v4, %v933_v41 }
 0x7c5   :  { %v970_v35 = vmul.f32 %v2546_v56, %v967_v24 }
 0x7c7   :  { %v2558_v25 = vadd.f32 %v2548_v9, %v970_v35 }
 0x7c9   :  { %1949 = vmatmul.msk.f32.gmra.mxu2 %vm85_vm0, %v2558_v25 }
 0x838   :  { %v997_v5 = vpop.f32.mrf.mxu2 }
 0x839   :  { %v2562_v27 = vadd.f32 %v2119_v26, %v997_v5 }
 0x83b   :  { %1013 = vrot.lane.b32.xlu0 %v2562_v27, %s2210_s0  ;;  %1005 = vrot.lane.b32.xlu2 %v2562_v27, %s2211_s1 }
 0x843   :  { %1009 = vrot.lane.b32.xlu0 %v2562_v27, %s2212_s21 }
 0x84c   :  { %v1000_v29 = vpop.f32.mrf.mxu2 }
 0x84d   :  { %v2570_v0 = vadd.f32 %v2119_v26, %v1000_v29  ;;  %v2124_v29 = vld [vmem:[#allocation5 + $0xc8] sm:$0xff] }
 0x84f   :  { %1015 = vrot.lane.b32.xlu2 %v2570_v0, %s2210_s0  ;;  %1007 = vrot.lane.b32.xlu1 %v2570_v0, %s2211_s1 }
 0x857   :  { %1017 = vrot.lane.b32.xlu2 %v2562_v27, %s2213_s22  ;;  %1011 = vrot.lane.b32.xlu1 %v2570_v0, %s2212_s21 }
 0x895   :  { %v2580_v31 = vpop.permute.xlu2 %1005 }
 0x896   :  { %1069 = vrot.lane.b32.xlu0 %v2580_v31, %s2213_s22 }
 0x89e   :  { %1043 = vrot.lane.b32.xlu0 %v2570_v0, %s2213_s22 }
 0x8a9   :  { %v2586_v33 = vpop.permute.xlu2 %1015 }
 0x8ad   :  { %v2588_v2 = vpop.permute.xlu0 %1013 }
 0x8ae   :  { %1173 = vrot.lane.b32.xlu2 %v2588_v2, %s2213_s22 }
 0x8b1   :  { %v1018_v30 = vpop.permute.xlu2 %1017 }
 0x8b2   :  { %1950 = vmatpush.xpose.msk.msra.mxu3 %vm131_vm1, %v1018_v30 }
 0x8b5   :  { %1951 = vmatmul.msk.f32.vlgmr.msra.gmra.mxu3 %vm131_vm1, %v2562_v27  ;;  %v2595_v39 = vpop.permute.xlu0 %1009 }
 0x8b6   :  { %1121 = vrot.lane.b32.xlu2 %v2595_v39, %s2213_s22 }
 0x8c1   :  { %v2599_v40 = vpop.permute.xlu1 %1007 }
 0x8c2   :  { %1095 = vrot.lane.b32.xlu1 %v2599_v40, %s2213_s22 }
 0x8c9   :  { %v2603_v41 = vpop.permute.xlu1 %1011 }
 0x8ca   :  { %1199 = vrot.lane.b32.xlu1 %v2586_v33, %s2213_s22  ;;  %1147 = vrot.lane.b32.xlu0 %v2603_v41, %s2213_s22 }
 0x908   :  { %v1174_v44 = vpop.permute.xlu2 %1173  ;;  %v1070_v45 = vpop.permute.xlu0 %1069 }
 0x909   :  { %1954 = vmatpush.xpose.msk.msrb.mxu2 %vm131_vm1, %v1070_v45 }
 0x90c   :  { %1955 = vmatmul.msk.f32.vlgmr.msrb.gmra.mxu2 %vm131_vm1, %v2580_v31 }
 0x90d   :  { %1962 = vmatpush.xpose.msk.msra.mxu2 %vm131_vm1, %v1174_v44 }
 0x910   :  { %v1122_v46 = vpop.permute.xlu2 %1121  ;;  %v1044_v47 = vpop.permute.xlu0 %1043 }
 0x911   :  { %1952 = vmatpush.xpose.msk.msra.mxu0 %vm131_vm1, %v1044_v47 }
 0x914   :  { %1953 = vmatmul.msk.f32.vlgmr.msra.gmra.mxu0 %vm131_vm1, %v2570_v0  ;;  %1963 = vmatmul.msk.f32.vlgmr.msra.gmra.mxu2 %vm131_vm1, %v2588_v2 }
 0x915   :  { %1958 = vmatpush.xpose.msk.msrb.mxu0 %vm131_vm1, %v1122_v46  ;;  %v2125_v46 = vld [vmem:[#allocation5 + $0xd8] sm:$0xff] }
 0x91c   :  { %1959 = vmatmul.msk.f32.vlgmr.msrb.gmra.mxu0 %vm131_vm1, %v2595_v39 }
 0x934   :  { %v1096_v23 = vpop.permute.xlu1 %1095 }
 0x935   :  { %1956 = vmatpush.xpose.msk.msrb.mxu3 %vm131_vm1, %v1096_v23 }
 0x938   :  { %v1040_v36 = vpop.f32.mrf.mxu3  ;;  %1957 = vmatmul.msk.f32.vlgmr.msrb.gmra.mxu3 %vm131_vm1, %v2599_v40 }
 0x939   :  { %v1041_v55 = vadd.f32 %v2120_v54, %v1040_v36 }
 0x93b   :  { %v1225_v28 = vsel %vm131_vm1, %v1041_v55, -inf }
 0x93c   :  { %v1200_v59 = vpop.permute.xlu1 %1199  ;;  %1226 = vmax.xlane.f32.xlu2 %v1225_v28  ;;  %v1148_v61 = vpop.permute.xlu0 %1147  ;;  %v2126_v28 = vld [vmem:[#allocation5 + $0xe8] sm:$0xff] }
 0x93d   :  { %1960 = vmatpush.xpose.msk.msra.mxu1 %vm131_vm1, %v1148_v61  ;;  %1964 = vmatpush.xpose.msk.msra.mxu3 %vm131_vm1, %v1200_v59 }
 0x940   :  { %1961 = vmatmul.msk.f32.vlgmr.msra.gmra.mxu1 %vm131_vm1, %v2603_v41  ;;  %1965 = vmatmul.msk.f32.vlgmr.msra.gmra.mxu3 %vm131_vm1, %v2586_v33 }
 0x98f   :  { %v1092_v62 = vpop.f32.mrf.mxu2 }
 0x990   :  { %v1093_v6 = vadd.f32 %v2121_v63, %v1092_v62  ;;  %v2013_v63 = vpack.i.bf16 %v2588_v2, %v2599_v40 }
 0x991   :  { %v1066_v15 = vpop.f32.mrf.mxu0 }
 0x992   :  { %v1067_v17 = vadd.f32 %v2122_v7, %v1066_v15  ;;  %v1231_v8 = vsel %vm131_vm1, %v1093_v6, -inf }
 0x993   :  { %1232 = vmax.xlane.f32.xlu1 %v1231_v8 }
 0x994   :  { %v1228_v10 = vsel %vm131_vm1, %v1067_v17, -inf }
 0x995   :  { %1229 = vmax.xlane.f32.xlu2 %v1228_v10 }
 0x997   :  { %v1196_v12 = vpop.f32.mrf.mxu2 }
 0x998   :  { %v1197_v34 = vadd.f32 %v1196_v12, %v2345_v58 }
 0x999   :  { %v1144_v11 = vpop.f32.mrf.mxu0 }
 0x99a   :  { %v1145_v4 = vadd.f32 %v2123_v13, %v1144_v11  ;;  %v1243_v24 = vsel %vm131_vm1, %v1197_v34, -inf }
 0x99b   :  { %1244 = vmax.xlane.f32.xlu1 %v1243_v24 }
 0x99c   :  { %v1237_v35 = vsel %vm131_vm1, %v1145_v4, -inf }
 0x99d   :  { %1238 = vmax.xlane.f32.xlu0 %v1237_v35 }
 0x9af   :  { %v1227_v5 = vpop.xlane.xlu2 %1226 }
 0x9b0   :  { %v1249_v44 = vsub.f32 %v1041_v55, %v1227_v5 }
 0x9b2   :  { %v1257_v36 = vmul.f32 1.442695, %v1249_v44 }
 0x9b4   :  { %2075 = vpow2.f32 %v1257_v36 }
 0x9ba   :  { %v2639_v62 = vpop.eup %2075 }
 0x9bb   :  { %v1118_v26 = vpop.f32.mrf.mxu3  ;;  %v1273_v55 = vsel %vm131_vm1, %v2639_v62, 0.0 }
 0x9bc   :  { %v1119_v30 = vadd.f32 %v2124_v29, %v1118_v26 }
 0x9bd   :  { %v1170_v45 = vpop.f32.mrf.mxu1 }
 0x9be   :  { %v1171_v47 = vadd.f32 %v2125_v46, %v1170_v45  ;;  %v1234_v23 = vsel %vm131_vm1, %v1119_v30, -inf  ;;  %v2008_v46 = vpack.i.bf16 %v2562_v27, %v2580_v31 }
 0x9bf   :  { %1235 = vmax.xlane.f32.xlu0 %v1234_v23 }
 0x9c0   :  { %v1240_v58 = vsel %vm131_vm1, %v1171_v47, -inf }
 0x9c1   :  { %1241 = vmax.xlane.f32.xlu2 %v1240_v58 }
 0x9c3   :  { %v1222_v54 = vpop.f32.mrf.mxu3 }
 0x9c4   :  { %v1223_v59 = vadd.f32 %v2126_v28, %v1222_v54 }
 0x9c6   :  { %v1246_v61 = vsel %vm131_vm1, %v1223_v59, -inf }
 0x9c7   :  { %1247 = vmax.xlane.f32.xlu1 %v1246_v61 }
 0x9cf   :  { %1274 = vadd.xlane.f32.xlu1 %v1273_v55 }
 0x9d3   :  { %2014 = vrot.lane.b32.xlu0 %v2013_v63, %s2214_s23 }
 0xa06   :  { %v1233_v15 = vpop.xlane.xlu1 %1232 }
 0xa07   :  { %v1251_v7 = vsub.f32 %v1093_v6, %v1233_v15 }
 0xa08   :  { %v1230_v8 = vpop.xlane.xlu2 %1229 }
 0xa09   :  { %v1261_v10 = vmul.f32 1.442695, %v1251_v7  ;;  %v1250_v12 = vsub.f32 %v1067_v17, %v1230_v8 }
 0xa0b   :  { %2077 = vpow2.f32 %v1261_v10  ;;  %v1259_v11 = vmul.f32 1.442695, %v1250_v12  ;;  %v2018_v10 = vpack.i.bf16 %v2595_v39, %v2570_v0 }
 0xa0d   :  { %2079 = vpow2.f32 %v1259_v11 }
 0xa0e   :  { %v1245_v13 = vpop.xlane.xlu1 %1244 }
 0xa0f   :  { %v1255_v24 = vsub.f32 %v1197_v34, %v1245_v13 }
 0xa10   :  { %v1239_v35 = vpop.xlane.xlu0 %1238 }
 0xa11   :  { %v2646_v5 = vpop.eup %2077  ;;  %v1269_v26 = vmul.f32 1.442695, %v1255_v24  ;;  %v1253_v29 = vsub.f32 %v1145_v4, %v1239_v35 }
 0xa12   :  { %v1279_v2 = vsel %vm131_vm1, %v2646_v5, 0.0 }
 0xa13   :  { %v2650_v40 = vpop.eup %2079  ;;  %2081 = vpow2.f32 %v1269_v26  ;;  %v1265_v6 = vmul.f32 1.442695, %v1253_v29  ;;  %1280 = vadd.xlane.f32.xlu0 %v1279_v2 }
 0xa14   :  { %v1276_v17 = vsel %vm131_vm1, %v2650_v40, 0.0 }
 0xa15   :  { %2083 = vpow2.f32 %v1265_v6  ;;  %1277 = vadd.xlane.f32.xlu1 %v1276_v17 }
 0xa19   :  { %v2654_v44 = vpop.eup %2081 }
 0xa1a   :  { %v1291_v34 = vsel %vm131_vm1, %v2654_v44, 0.0 }
 0xa1b   :  { %v2658_v45 = vpop.eup %2083  ;;  %1292 = vadd.xlane.f32.xlu0 %v1291_v34 }
 0xa1c   :  { %v1285_v4 = vsel %vm131_vm1, %v2658_v45, 0.0 }
 0xa1d   :  { %1286 = vadd.xlane.f32.xlu2 %v1285_v4 }
 0xa2e   :  { %2009 = vrot.lane.b32.xlu1 %v2008_v46, %s2214_s23 }
 0xa32   :  { %v1236_v23 = vpop.xlane.xlu0 %1235 }
 0xa33   :  { %v1252_v54 = vsub.f32 %v1119_v30, %v1236_v23 }
 0xa34   :  { %v1242_v58 = vpop.xlane.xlu2 %1241 }
 0xa35   :  { %v1254_v36 = vsub.f32 %v1171_v47, %v1242_v58  ;;  %v1263_v61 = vmul.f32 1.442695, %v1252_v54 }
 0xa36   :  { %1599 = vrot.lane.b32.xlu1 %v2586_v33, %s2214_s23 }
 0xa37   :  { %v1267_v28 = vmul.f32 1.442695, %v1254_v36 }
 0xa39   :  { %2085 = vpow2.f32 %v1267_v28 }
 0xa3a   :  { %v1248_v55 = vpop.xlane.xlu1 %1247  ;;  %2087 = vpow2.f32 %v1263_v61 }
 0xa3b   :  { %v1256_v63 = vsub.f32 %v1223_v59, %v1248_v55 }
 0xa3d   :  { %v1271_v15 = vmul.f32 1.442695, %v1256_v63 }
 0xa3f   :  { %v2667_v7 = vpop.eup %2085  ;;  %2089 = vpow2.f32 %v1271_v15 }
 0xa40   :  { %v1288_v27 = vsel %vm131_vm1, %v2667_v7, 0.0  ;;  %v2671_v31 = vpop.eup %2087 }
 0xa41   :  { %1289 = vadd.xlane.f32.xlu2 %v1288_v27  ;;  %v1282_v8 = vsel %vm131_vm1, %v2671_v31, 0.0 }
 0xa42   :  { %v1275_v12 = vpop.xlane.xlu1 %1274 }
 0xa43   :  { %2091 = vrcp.f32 %v1275_v12  ;;  %vm1302_vm12 = vweird.f32 %v1275_v12  ;;  %v1308_v58 = vand.u32 2147483648, %v1275_v12  ;;  %v1306_v54 = vand.u32 2147483647, %v1275_v12 }
 0xa45   :  { %v2673_v30 = vpop.eup %2089  ;;  %v2675_v47 = vpop.permute.xlu0 %2014  ;;  %v1309_v15 = vor.u32 1.1754944e-38, %v1308_v58  ;;  %vm1307_vm3 = vcmp.eq.f32.partialorder %v1306_v54, 8.507059e+37 }
 0xa46   :  { %v2016_v33 = vunpack.i.l.bf16 %v2675_v47  ;;  %v1294_v59 = vsel %vm131_vm1, %v2673_v30, 0.0 }
 0xa47   :  { %1295 = vadd.xlane.f32.xlu0 %v1294_v59 }
 0xa48   :  { %1516 = vmatpush.msrb.mxu3 %v2016_v33 }
 0xa49   :  { %1283 = vadd.xlane.f32.xlu2 %v1282_v8  ;;  %v2092_v13 = vpop.eup %2091 }
 0xa4a   :  { %v1298_v24 = vmul.f32 %v2092_v13, %v1275_v12  ;;  %vm1303_vm10 = vweird.f32 %v2092_v13 }
 0xa4b   :  { %vm1304_vm13 = vmor %vm1302_vm12, %vm1303_vm10 }
 0xa4c   :  { %v1299_v2 = vsub.f32 1.0, %v1298_v24 }
 0xa4e   :  { %v1300_v17 = vmul.f32 %v2092_v13, %v1299_v2 }
 0xa50   :  { %v1301_v0 = vadd.f32 %v2092_v13, %v1300_v17 }
 0xa52   :  { %v1305_v61 = vsel %vm1304_vm13, %v2092_v13, %v1301_v0 }
 0xa53   :  { %v1310_v33 = vsel %vm1307_vm3, %v1309_v15, %v1305_v61 }
 0xa54   :  { %v1409_v13 = vmul.f32 %v2639_v62, %v1310_v33 }
 0xa5b   :  { %1547 = vrot.lane.b32.xlu0 %v2603_v41, %s2214_s23 }
 0xa61   :  { %2019 = vrot.lane.b32.xlu2 %v2018_v10, %s2214_s23 }
 0xa86   :  { %v1281_v11 = vpop.xlane.xlu0 %1280 }
 0xa87   :  { %2093 = vrcp.f32 %v1281_v11  ;;  %v1336_v36 = vand.u32 2147483648, %v1281_v11  ;;  %vm1330_vm14 = vweird.f32 %v1281_v11  ;;  %v1334_v28 = vand.u32 2147483647, %v1281_v11 }
 0xa88   :  { %v2687_v46 = vpop.xlane.xlu1 %1277 }
 0xa89   :  { %v1337_v27 = vor.u32 1.1754944e-38, %v1336_v36  ;;  %vm1335_vm4 = vcmp.eq.f32.partialorder %v1334_v28, 8.507059e+37  ;;  %vm1316_vm13 = vweird.f32 %v2687_v46 }
 0xa8d   :  { %v2094_v35 = vpop.eup %2093 }
 0xa8e   :  { %v1326_v26 = vmul.f32 %v2094_v35, %v1281_v11  ;;  %v1293_v29 = vpop.xlane.xlu0 %1292  ;;  %vm1331_vm11 = vweird.f32 %v2094_v35 }
 0xa8f   :  { %2095 = vrcp.f32 %v1293_v29  ;;  %vm1332_vm2 = vmor %vm1330_vm14, %vm1331_vm11  ;;  %v1392_v24 = vand.u32 2147483648, %v1293_v29  ;;  %vm1386_vm8 = vweird.f32 %v1293_v29  ;;  %v1390_v11 = vand.u32 2147483647, %v1293_v29 }
 0xa90   :  { %v1327_v6 = vsub.f32 1.0, %v1326_v26  ;;  %v2689_v26 = vpop.xlane.xlu2 %1286  ;;  %2097 = vrcp.f32 %v2687_v46 }
 0xa91   :  { %2099 = vrcp.f32 %v2689_v26  ;;  %vm1391_vm10 = vcmp.eq.f32.partialorder %v1390_v11, 8.507059e+37  ;;  %v1362_v28 = vand.u32 2147483647, %v2689_v26 }
 0xa92   :  { %v1328_v34 = vmul.f32 %v2094_v35, %v1327_v6  ;;  %v2017_v6 = vunpack.i.h.bf16 %v2675_v47 }
 0xa94   :  { %v1329_v39 = vadd.f32 %v2094_v35, %v1328_v34  ;;  %v1393_v34 = vor.u32 1.1754944e-38, %v1392_v24 }
 0xa95   :  { %v2096_v41 = vpop.eup %2095 }
 0xa96   :  { %v1382_v4 = vmul.f32 %v2096_v41, %v1293_v29  ;;  %v1333_v55 = vsel %vm1332_vm2, %v2094_v35, %v1329_v39  ;;  %vm1387_vm5 = vweird.f32 %v2096_v41  ;;  %v2098_v47 = vpop.eup %2097  ;;  %vm1358_vm2 = vweird.f32 %v2689_v26 }
 0xa97   :  { %v1338_v59 = vsel %vm1335_vm4, %v1337_v27, %v1333_v55  ;;  %vm1388_vm9 = vmor %vm1386_vm8, %vm1387_vm5  ;;  %v2100_v29 = vpop.eup %2099  ;;  %vm1317_vm11 = vweird.f32 %v2098_v47  ;;  %vm1363_vm5 = vcmp.eq.f32.partialorder %v1362_v28, 8.507059e+37 }
 0xa98   :  { %v1383_v23 = vsub.f32 1.0, %v1382_v4  ;;  %v1411_v35 = vmul.f32 %v2646_v5, %v1338_v59  ;;  %v1312_v4 = vmul.f32 %v2098_v47, %v2687_v46  ;;  %v1354_v0 = vmul.f32 %v2100_v29, %v2689_v26  ;;  %vm1318_vm14 = vmor %vm1316_vm13, %vm1317_vm11 }
 0xa99   :  { %vm1359_vm12 = vweird.f32 %v2100_v29 }
 0xa9a   :  { %v1384_v63 = vmul.f32 %v2096_v41, %v1383_v23  ;;  %v1355_v39 = vsub.f32 1.0, %v1354_v0  ;;  %vm1360_vm3 = vmor %vm1358_vm2, %vm1359_vm12 }
 0xa9c   :  { %v1385_v8 = vadd.f32 %v2096_v41, %v1384_v63 }
 0xa9e   :  { %v1389_v17 = vsel %vm1388_vm9, %v2096_v41, %v1385_v8 }
 0xa9f   :  { %v1394_v62 = vsel %vm1391_vm10, %v1393_v34, %v1389_v17 }
 0xaa0   :  { %v2010_v10 = vpop.permute.xlu1 %2009  ;;  %v1415_v41 = vmul.f32 %v2654_v44, %v1394_v62  ;;  %v1356_v44 = vmul.f32 %v2100_v29, %v1355_v39 }
 0xaa1   :  { %v2012_v2 = vunpack.i.h.bf16 %v2010_v10  ;;  %v2011_v12 = vunpack.i.l.bf16 %v2010_v10 }
 0xaa2   :  { %v1357_v36 = vadd.f32 %v2100_v29, %v1356_v44 }
 0xaa3   :  { %1438 = vmatpush.msra.mxu0 %v2012_v2  ;;  %1490 = vmatpush.msrb.mxu2 %v2011_v12 }
 0xaa4   :  { %1966 = vmatmul.msk.f32.vlgmr.msra.gmra.mxu0 %vm131_vm1, %v1409_v13  ;;  %1968 = vmatmul.msk.f32.vlgmr.msrb.gmra.mxu2 %vm131_vm1, %v1411_v35  ;;  %v1361_v15 = vsel %vm1360_vm3, %v2100_v29, %v1357_v36 }
 0xaa5   :  { %1594 = vmatpush.msra.mxu2 %v2017_v6 }
 0xaa7   :  { %1779 = vmatpush.msrb.mxu2 %v2493_v42  ;;  %v1313_v42 = vsub.f32 1.0, %v1312_v4 }
 0xaa8   :  { %v1600_v5 = vpop.permute.xlu1 %1599 }
 0xaa9   :  { %1780 = vmatpush.msrb.mxu2 %v2495_v43  ;;  %1620 = vmatpush.msra.mxu3 %v1600_v5 }
 0xaab   :  { %1781 = vmatpush.msrb.mxu2 %v2498_v3  ;;  %v1314_v3 = vmul.f32 %v2098_v47, %v1313_v42 }
 0xaac   :  { %1972 = vmatmul.msk.f32.vlgmr.msra.gmra.mxu2 %vm131_vm1, %v1415_v41 }
 0xaad   :  { %1782 = vmatpush.msrb.mxu2 %v2502_v48  ;;  %v1315_v48 = vadd.f32 %v2098_v47, %v1314_v3 }
 0xaaf   :  { %1783 = vmatpush.msrb.mxu2 %v2505_v60  ;;  %v1322_v60 = vand.u32 2147483648, %v2687_v46  ;;  %v1319_v55 = vsel %vm1318_vm14, %v2098_v47, %v1315_v48 }
 0xab1   :  { %1784 = vmatpush.msrb.mxu2 %v2519_v16  ;;  %v1323_v63 = vor.u32 1.1754944e-38, %v1322_v60 }
 0xab3   :  { %1785 = vmatpush.msrb.mxu2 %v2522_v20  ;;  %v1320_v20 = vand.u32 2147483647, %v2687_v46 }
 0xab4   :  { %v2707_v43 = vpop.xlane.xlu2 %1289 }
 0xab5   :  { %2101 = vrcp.f32 %v2707_v43  ;;  %1786 = vmatpush.msrb.mxu2 %v2524_v21  ;;  %v1364_v21 = vand.u32 2147483648, %v2689_v26  ;;  %vm1321_vm4 = vcmp.eq.f32.partialorder %v1320_v20, 8.507059e+37  ;;  %v1378_v13 = vand.u32 2147483648, %v2707_v43 }
 0xab6   :  { %v1324_v8 = vsel %vm1321_vm4, %v1323_v63, %v1319_v55  ;;  %vm1372_vm9 = vweird.f32 %v2707_v43  ;;  %v1376_v34 = vand.u32 2147483647, %v2707_v43 }
 0xab7   :  { %v1365_v59 = vor.u32 1.1754944e-38, %v1364_v21  ;;  %v1410_v17 = vmul.f32 %v2650_v40, %v1324_v8 }
 0xab8   :  { %vm1377_vm12 = vcmp.eq.f32.partialorder %v1376_v34, 8.507059e+37 }
 0xab9   :  { %v1366_v24 = vsel %vm1363_vm5, %v1365_v59, %v1361_v15 }
 0xaba   :  { %v2713_v23 = vpop.xlane.xlu0 %1295  ;;  %v1413_v5 = vmul.f32 %v2658_v45, %v1366_v24  ;;  %v1379_v45 = vor.u32 1.1754944e-38, %v1378_v13  ;;  %v2127_v24 = vld [vmem:[#allocation5 + $0xa1] ss:$0 sm:$0xff] }
 0xabb   :  { %v2102_v58 = vpop.eup %2101  ;;  %2103 = vrcp.f32 %v2713_v23  ;;  %vm1400_vm4 = vweird.f32 %v2713_v23 }
 0xabc   :  { %v1368_v16 = vmul.f32 %v2102_v58, %v2707_v43  ;;  %v1284_v54 = vpop.xlane.xlu2 %1283  ;;  %vm1373_vm8 = vweird.f32 %v2102_v58 }
 0xabd   :  { %2105 = vrcp.f32 %v1284_v54  ;;  %vm2732_vm10 = vmor %vm1372_vm9, %vm1373_vm8  ;;  %v1348_v29 = vand.u32 2147483647, %v1284_v54  ;;  %v1350_v41 = vand.u32 2147483648, %v1284_v54  ;;  %vm1344_vm13 = vweird.f32 %v1284_v54 }
 0xabe   :  { %v1369_v61 = vsub.f32 1.0, %v1368_v16 }
 0xabf   :  { %v1351_v43 = vor.u32 1.1754944e-38, %v1350_v41  ;;  %vm1349_vm3 = vcmp.eq.f32.partialorder %v1348_v29, 8.507059e+37 }
 0xac0   :  { %v1370_v27 = vmul.f32 %v2102_v58, %v1369_v61 }
 0xac1   :  { %v2723_v33 = vpop.eup %2103 }
 0xac2   :  { %v1396_v46 = vmul.f32 %v2723_v33, %v2713_v23  ;;  %v1371_v2 = vadd.f32 %v2102_v58, %v1370_v27  ;;  %vm1401_vm2 = vweird.f32 %v2723_v33 }
 0xac3   :  { %v2106_v10 = vpop.eup %2105  ;;  %vm1402_vm5 = vmor %vm1400_vm4, %vm1401_vm2 }
 0xac4   :  { %v1397_v26 = vsub.f32 1.0, %v1396_v46  ;;  %v1340_v12 = vmul.f32 %v2106_v10, %v1284_v54  ;;  %v2020_v11 = vpop.permute.xlu2 %2019  ;;  %v1375_v4 = vsel %vm2732_vm10, %v2102_v58, %v1371_v2  ;;  %vm1345_vm11 = vweird.f32 %v2106_v10 }
 0xac5   :  { %v2022_v35 = vunpack.i.h.bf16 %v2020_v11  ;;  %v2021_v6 = vunpack.i.l.bf16 %v2020_v11  ;;  %v1380_v39 = vsel %vm1377_vm12, %v1379_v45, %v1375_v4  ;;  %vm1346_vm14 = vmor %vm1344_vm13, %vm1345_vm11  ;;  %v1406_v58 = vand.u32 2147483648, %v2713_v23 }
 0xac6   :  { %v1341_v62 = vsub.f32 1.0, %v1340_v12  ;;  %v1398_v40 = vmul.f32 %v2723_v33, %v1397_v26 }
 0xac7   :  { %1464 = vmatpush.msrb.mxu1 %v2021_v6  ;;  %1542 = vmatpush.msrb.mxu0 %v2022_v35 }
 0xac8   :  { %v1342_v0 = vmul.f32 %v2106_v10, %v1341_v62  ;;  %1967 = vmatmul.msk.f32.vlgmr.msrb.gmra.mxu1 %vm131_vm1, %v1410_v17  ;;  %1970 = vmatmul.msk.f32.vlgmr.msrb.gmra.mxu0 %vm131_vm1, %v1413_v5  ;;  %v1399_v3 = vadd.f32 %v2723_v33, %v1398_v40 }
 0xac9   :  { %1673 = vmatpush.msra.mxu0 %v2450_v49  ;;  %v1404_v49 = vand.u32 2147483647, %v2713_v23 }
 0xaca   :  { %v1343_v42 = vadd.f32 %v2106_v10, %v1342_v0  ;;  %v1403_v16 = vsel %vm1402_vm5, %v2723_v33, %v1399_v3 }
 0xacb   :  { %1674 = vmatpush.msra.mxu0 %v2452_v50  ;;  %v1414_v50 = vmul.f32 %v2667_v7, %v1380_v39  ;;  %vm1405_vm8 = vcmp.eq.f32.partialorder %v1404_v49, 8.507059e+37 }
 0xacc   :  { %v1347_v44 = vsel %vm1346_vm14, %v2106_v10, %v1343_v42 }
 0xacd   :  { %v1352_v48 = vsel %vm1349_vm3, %v1351_v43, %v1347_v44  ;;  %v1548_v60 = vpop.permute.xlu0 %1547  ;;  %1675 = vmatpush.msra.mxu0 %v2456_v51  ;;  %v1407_v51 = vor.u32 1.1754944e-38, %v1406_v58 }
 0xace   :  { %1568 = vmatpush.msra.mxu1 %v1548_v60  ;;  %v1412_v36 = vmul.f32 %v2671_v31, %v1352_v48 }
 0xacf   :  { %1676 = vmatpush.msra.mxu0 %v2458_v52  ;;  %v1408_v23 = vsel %vm1405_vm8, %v1407_v51, %v1403_v16 }
 0xad0   :  { %1752 = vmatpush.msrb.mxu1 %v2480_v32  ;;  %1969 = vmatmul.msk.f32.vlgmr.msrb.gmra.mxu3 %vm131_vm1, %v1412_v36  ;;  %v1416_v7 = vmul.f32 %v2673_v30, %v1408_v23 }
 0xad1   :  { %1971 = vmatmul.msk.f32.vlgmr.msra.gmra.mxu1 %vm131_vm1, %v1414_v50 }
 0xad2   :  { %1753 = vmatpush.msrb.mxu1 %v2483_v1 }
 0xad4   :  { %1754 = vmatpush.msrb.mxu1 %v2486_v37 }
 0xad6   :  { %1755 = vmatpush.msrb.mxu1 %v2489_v38 }
 0xad8   :  { %1973 = vmatmul.msk.f32.vlgmr.msra.gmra.mxu3 %vm131_vm1, %v1416_v7 }
 0xb21   :  { %v1440_v31 = vpop.f32.mrf.mxu0 }
 0xb27   :  { %v1492_v52 = vpop.f32.mrf.mxu2 }
 0xb28   :  { %1627 = vrot.lane.b32.xlu1 %v1492_v52, %s2208_s18 }
 0xb2f   :  { %v1596_v32 = vpop.f32.mrf.mxu2 }
 0xb30   :  { %1643 = vrot.lane.b32.xlu2 %v1596_v32, %s2216_s25 }
 0xb45   :  { %v1466_v54 = vpop.f32.mrf.mxu1  ;;  %v1544_v20 = vpop.f32.mrf.mxu0 }
 0xb46   :  { %1635 = vrot.lane.b32.xlu0 %v1544_v20, %s2215_s24 }
 0xb4e   :  { %v1570_v1 = vpop.f32.mrf.mxu1 }
 0xb4f   :  { %1637 = vrot.lane.b32.xlu0 %v1570_v1, %s2215_s24 }
 0xb53   :  { %v1518_v37 = vpop.f32.mrf.mxu3 }
 0xb54   :  { %1629 = vrot.lane.b32.xlu1 %v1518_v37, %s2208_s18 }
 0xb5b   :  { %v1622_v38 = vpop.f32.mrf.mxu3 }
 0xb5c   :  { %1645 = vrot.lane.b32.xlu2 %v1622_v38, %s2216_s25 }
 0xb8a   :  { %v1644_v61 = vpop.permute.xlu2 %1643 }
 0xb9a   :  { %v1628_v30 = vpop.permute.xlu1 %1627 }
 0xb9b   :  { %v1649_v21 = vsel %vm131_vm1, %v1440_v31, %v1628_v30 }
 0xbb6   :  { %v1646_v59 = vpop.permute.xlu2 %1645 }
 0xbb8   :  { %v1636_v28 = vpop.permute.xlu0 %1635 }
 0xbb9   :  { %v1651_v55 = vsel %vm764_vm6, %v1649_v21, %v1636_v28 }
 0xbba   :  { %v1653_v63 = vsel %vm767_vm7, %v1651_v55, %v1644_v61 }
 0xbbb   :  { %1974 = vmatmul.msk.f32.vlgmr.msra.gmra.mxu0 %vm85_vm0, %v1653_v63 }
 0xbc1   :  { %v1638_v27 = vpop.permute.xlu0 %1637 }
 0xbc6   :  { %v1630_v15 = vpop.permute.xlu1 %1629 }
 0xbc7   :  { %v1650_v33 = vsel %vm131_vm1, %v1466_v54, %v1630_v15 }
 0xbc8   :  { %v1652_v8 = vsel %vm764_vm6, %v1650_v33, %v1638_v27 }
 0xbc9   :  { %v1654_v46 = vsel %vm767_vm7, %v1652_v8, %v1646_v59 }
 0xbca   :  { %1975 = vmatmul.msk.f32.gmra.mxu0 %vm85_vm0, %v1654_v46 }
 0xc38   :  { %v1678_v10 = vpop.f32.mrf.mxu0 }
 0xc39   :  { %v1679_v2 = vadd.f32 %v2127_v24, %v1678_v10 }
 0xc3b   :  { %v1684_v26 = vadd.f32 %v1679_v2, %v2552_v19 }
 0xc3d   :  { %v1686_v12 = vsel %vm85_vm0, %v1684_v26, 0.0 }
 0xc3e   :  { %1687 = vadd.xlane.f32.xlu1 %v1686_v12 }
 0xc47   :  { %v1681_v11 = vpop.f32.mrf.mxu0 }
 0xc48   :  { %v1682_v13 = vadd.f32 %v2127_v24, %v1681_v11 }
 0xc4a   :  { %v1685_v35 = vadd.f32 %v1682_v13, %v2558_v25 }
 0xc4c   :  { %v1689_v6 = vsel %vm85_vm0, %v1685_v35, 0.0 }
 0xc4d   :  { %1690 = vadd.xlane.f32.xlu0 %v1689_v6 }
 0xcb1   :  { %v1688_v17 = vpop.xlane.xlu1 %1687 }
 0xcb2   :  { %v1692_v34 = vmul.f32 %v1688_v17, %v2474_v14 }
 0xcb4   :  { %v1694_v62 = vsub.f32 %v1684_v26, %v1692_v34 }
 0xcb6   :  { %v1696_v5 = vmul.f32 %v1694_v62, %v1694_v62 }
 0xcb8   :  { %v1698_v47 = vsel %vm85_vm0, %v1696_v5, 0.0 }
 0xcb9   :  { %1699 = vadd.xlane.f32.xlu2 %v1698_v47 }
 0xcc0   :  { %v1691_v29 = vpop.xlane.xlu0 %1690 }
 0xcc1   :  { %v1693_v19 = vmul.f32 %v1691_v29, %v2474_v14 }
 0xcc3   :  { %v1695_v41 = vsub.f32 %v1685_v35, %v1693_v19 }
 0xcc5   :  { %v1697_v4 = vmul.f32 %v1695_v41, %v1695_v41 }
 0xcc7   :  { %v1701_v40 = vsel %vm85_vm0, %v1697_v4, 0.0 }
 0xcc8   :  { %1702 = vadd.xlane.f32.xlu1 %v1701_v40 }
 0xd2c   :  { %v1700_v25 = vpop.xlane.xlu2 %1699 }
 0xd2d   :  { %v1704_v0 = vmul.f32 %v1700_v25, %v2474_v14 }
 0xd2f   :  { %v1706_v45 = vadd.f32 1e-05, %v1704_v0 }
 0xd31   :  { %2107 = vrsqrt.f32 %v1706_v45  ;;  %vm1714_vm6 = vweird.f32 %v1706_v45 }
 0xd37   :  { %v2108_v42 = vpop.eup %2107 }
 0xd38   :  { %v1709_v39 = vmul.f32 %v2108_v42, %v1706_v45  ;;  %vm1715_vm1 = vweird.f32 %v2108_v42 }
 0xd39   :  { %vm1716_vm7 = vmor %vm1714_vm6, %vm1715_vm1 }
 0xd3a   :  { %v1710_v43 = vmul.f32 %v2108_v42, %v1709_v39 }
 0xd3b   :  { %v1703_v3 = vpop.xlane.xlu1 %1702 }
 0xd3c   :  { %v1711_v44 = vmul.f32 0.5, %v1710_v43  ;;  %v1705_v58 = vmul.f32 %v1703_v3, %v2474_v14 }
 0xd3e   :  { %v1712_v48 = vsub.f32 1.5, %v1711_v44  ;;  %v1707_v60 = vadd.f32 1e-05, %v1705_v58 }
 0xd40   :  { %v1713_v49 = vmul.f32 %v2108_v42, %v1712_v48  ;;  %2109 = vrsqrt.f32 %v1707_v60  ;;  %vm1724_vm10 = vweird.f32 %v1707_v60 }
 0xd42   :  { %v1717_v36 = vsel %vm1716_vm7, %v2108_v42, %v1713_v49 }
 0xd43   :  { %v1728_v50 = vmul.f32 %v1717_v36, %v1694_v62 }
 0xd45   :  { %v1730_v16 = vmul.f32 %v2507_v53, %v1728_v50 }
 0xd46   :  { %v2110_v51 = vpop.eup %2109 }
 0xd47   :  { %v1719_v23 = vmul.f32 %v2110_v51, %v1707_v60  ;;  %v1732_v7 = vadd.f32 %v2510_v57, %v1730_v16  ;;  %vm1725_vm9 = vweird.f32 %v2110_v51 }
 0xd48   :  { %vm1726_vm11 = vmor %vm1724_vm10, %vm1725_vm9 }
 0xd49   :  { %v1720_v52 = vmul.f32 %v2110_v51, %v1719_v23  ;;  %1976 = vmatmul.msk.f32.vlgmr.msrb.gmra.mxu1 %vm85_vm0, %v1732_v7 }
 0xd4b   :  { %v1721_v32 = vmul.f32 0.5, %v1720_v52 }
 0xd4d   :  { %v1722_v31 = vsub.f32 1.5, %v1721_v32 }
 0xd4f   :  { %v1723_v54 = vmul.f32 %v2110_v51, %v1722_v31 }
 0xd51   :  { %v1727_v20 = vsel %vm1726_vm11, %v2110_v51, %v1723_v54 }
 0xd52   :  { %v1729_v1 = vmul.f32 %v1727_v20, %v1695_v41 }
 0xd54   :  { %v1731_v37 = vmul.f32 %v2507_v53, %v1729_v1 }
 0xd56   :  { %v1733_v38 = vadd.f32 %v2510_v57, %v1731_v37 }
 0xd58   :  { %1977 = vmatmul.msk.f32.gmra.mxu1 %vm85_vm0, %v1733_v38 }
 0xdc6   :  { %v1757_v30 = vpop.f32.mrf.mxu1 }
 0xdc7   :  { %v1758_v21 = vadd.f32 %v2528_v22, %v1757_v30 }
 0xdc9   :  { %v1763_v28 = vmax.f32 %v1758_v21, 0.0 }
 0xdcb   :  { %1978 = vmatmul.msk.f32.vlgmr.msrb.gmra.mxu2 %vm892_vm15, %v1763_v28 }
 0xdd5   :  { %v1760_v61 = vpop.f32.mrf.mxu1 }
 0xdd6   :  { %v1761_v55 = vadd.f32 %v2528_v22, %v1760_v61 }
 0xdd8   :  { %v1764_v63 = vmax.f32 %v1761_v55, 0.0 }
 0xdda   :  { %1979 = vmatmul.msk.f32.gmra.mxu2 %vm892_vm15, %v1764_v63 }
 0xe4e   :  { %v1788_v15 = vpop.f32.mrf.mxu2 }
 0xe4f   :  { %v1789_v27 = vadd.f32 %v2534_v18, %v1788_v15 }
 0xe51   :  { %v1794_v53 = vadd.f32 %v1789_v27, %v1732_v7 }
 0xe53   :  { %v1796_v57 = vsel %vm85_vm0, %v1794_v53, 0.0 }
 0xe54   :  { %1797 = vadd.xlane.f32.xlu0 %v1796_v57 }
 0xe5d   :  { %v1791_v33 = vpop.f32.mrf.mxu2 }
 0xe5e   :  { %v1792_v59 = vadd.f32 %v2534_v18, %v1791_v33 }
 0xe60   :  { %v1795_v8 = vadd.f32 %v1792_v59, %v1733_v38  ;;  %v2031_v59 = vld [vmem:[#allocation5 + $0xa8] ss:$0 sm:$0xff] }
 0xe62   :  { %v1799_v46 = vsel %vm85_vm0, %v1795_v8, 0.0 }
 0xe63   :  { %1800 = vadd.xlane.f32.xlu2 %v1799_v46 }
 0xec7   :  { %v1798_v10 = vpop.xlane.xlu0 %1797 }
 0xec8   :  { %v1802_v22 = vmul.f32 %v1798_v10, %v2474_v14  ;;  %v2032_v10 = vld [vmem:[#allocation5 + $0xa9] ss:$0 sm:$0xff] }
 0xeca   :  { %v1804_v24 = vsub.f32 %v1794_v53, %v1802_v22 }
 0xecc   :  { %v1806_v2 = vmul.f32 %v1804_v24, %v1804_v24 }
 0xece   :  { %v1808_v26 = vsel %vm85_vm0, %v1806_v2, 0.0 }
 0xecf   :  { %1809 = vadd.xlane.f32.xlu1 %v1808_v26 }
 0xed6   :  { %v1801_v12 = vpop.xlane.xlu2 %1800 }
 0xed7   :  { %v1803_v11 = vmul.f32 %v1801_v12, %v2474_v14 }
 0xed9   :  { %v1805_v13 = vsub.f32 %v1795_v8, %v1803_v11 }
 0xedb   :  { %v1807_v35 = vmul.f32 %v1805_v13, %v1805_v13 }
 0xedd   :  { %v1811_v6 = vsel %vm85_vm0, %v1807_v35, 0.0 }
 0xede   :  { %1812 = vadd.xlane.f32.xlu0 %v1811_v6 }
 0xf42   :  { %v1810_v18 = vpop.xlane.xlu1 %1809 }
 0xf43   :  { %v1814_v17 = vmul.f32 %v1810_v18, %v2474_v14 }
 0xf45   :  { %v1816_v34 = vadd.f32 1e-05, %v1814_v17 }
 0xf47   :  { %2111 = vrsqrt.f32 %v1816_v34  ;;  %vm1824_vm12 = vweird.f32 %v1816_v34 }
 0xf4d   :  { %v2112_v62 = vpop.eup %2111 }
 0xf4e   :  { %v1819_v5 = vmul.f32 %v2112_v62, %v1816_v34  ;;  %vm1825_vm15 = vweird.f32 %v2112_v62 }
 0xf4f   :  { %vm1826_vm13 = vmor %vm1824_vm12, %vm1825_vm15 }
 0xf50   :  { %v1820_v47 = vmul.f32 %v2112_v62, %v1819_v5 }
 0xf51   :  { %v1813_v29 = vpop.xlane.xlu0 %1812 }
 0xf52   :  { %v1821_v19 = vmul.f32 0.5, %v1820_v47  ;;  %v1815_v41 = vmul.f32 %v1813_v29, %v2474_v14 }
 0xf54   :  { %v1822_v4 = vsub.f32 1.5, %v1821_v19  ;;  %v1817_v40 = vadd.f32 1e-05, %v1815_v41 }
 0xf56   :  { %v1823_v25 = vmul.f32 %v2112_v62, %v1822_v4  ;;  %2113 = vrsqrt.f32 %v1817_v40  ;;  %vm1834_vm2 = vweird.f32 %v1817_v40 }
 0xf58   :  { %v1827_v0 = vsel %vm1826_vm13, %v2112_v62, %v1823_v25 }
 0xf59   :  { %v1838_v45 = vmul.f32 %v1827_v0, %v1804_v24 }
 0xf5b   :  { %v1840_v42 = vmul.f32 %v2546_v56, %v1838_v45 }
 0xf5c   :  { %v2114_v39 = vpop.eup %2113 }
 0xf5d   :  { %v1829_v43 = vmul.f32 %v2114_v39, %v1817_v40  ;;  %v1842_v3 = vadd.f32 %v2548_v9, %v1840_v42  ;;  %vm1835_vm14 = vweird.f32 %v2114_v39 }
 0xf5e   :  { %vm1836_vm3 = vmor %vm1834_vm2, %vm1835_vm14 }
 0xf5f   :  { %v1830_v44 = vmul.f32 %v2114_v39, %v1829_v43  ;;  %v1844_v58 = vsel %vm85_vm0, %v1842_v3, 0.0 }
 0xf60   :  { %1845 = vadd.xlane.f32.xlu2 %v1844_v58 }
 0xf61   :  { %v1831_v48 = vmul.f32 0.5, %v1830_v44 }
 0xf63   :  { %v1832_v60 = vsub.f32 1.5, %v1831_v48 }
 0xf65   :  { %v1833_v49 = vmul.f32 %v2114_v39, %v1832_v60 }
 0xf67   :  { %v1837_v36 = vsel %vm1836_vm3, %v2114_v39, %v1833_v49 }
 0xf68   :  { %v1839_v50 = vmul.f32 %v1837_v36, %v1805_v13 }
 0xf6a   :  { %v1841_v16 = vmul.f32 %v2546_v56, %v1839_v50 }
 0xf6c   :  { %v1843_v51 = vadd.f32 %v2548_v9, %v1841_v16 }
 0xf6e   :  { %v1847_v23 = vsel %vm85_vm0, %v1843_v51, 0.0 }
 0xf6f   :  { %1848 = vadd.xlane.f32.xlu1 %v1847_v23 }
 0xfd3   :  { %v1846_v7 = vpop.xlane.xlu2 %1845 }
 0xfd4   :  { %v1850_v52 = vmul.f32 %v1846_v7, %v2474_v14 }
 0xfd6   :  { %v1852_v32 = vsub.f32 %v1842_v3, %v1850_v52 }
 0xfd8   :  { %v1854_v31 = vmul.f32 %v1852_v32, %v1852_v32 }
 0xfda   :  { %v1856_v54 = vsel %vm85_vm0, %v1854_v31, 0.0 }
 0xfdb   :  { %1857 = vadd.xlane.f32.xlu0 %v1856_v54 }
 0xfe2   :  { %v1849_v20 = vpop.xlane.xlu1 %1848 }
 0xfe3   :  { %v1851_v1 = vmul.f32 %v1849_v20, %v2474_v14 }
 0xfe5   :  { %v1853_v37 = vsub.f32 %v1843_v51, %v1851_v1 }
 0xfe7   :  { %v1855_v38 = vmul.f32 %v1853_v37, %v1853_v37 }
 0xfe9   :  { %v1859_v56 = vsel %vm85_vm0, %v1855_v38, 0.0 }
 0xfea   :  { %1860 = vadd.xlane.f32.xlu2 %v1859_v56 }
0x104e   :  { %v1858_v9 = vpop.xlane.xlu0 %1857 }
0x104f   :  { %v1862_v30 = vmul.f32 %v1858_v9, %v2474_v14 }
0x1051   :  { %v1864_v21 = vadd.f32 1e-05, %v1862_v30 }
0x1053   :  { %2115 = vrsqrt.f32 %v1864_v21  ;;  %vm1872_vm5 = vweird.f32 %v1864_v21 }
0x1059   :  { %v2116_v28 = vpop.eup %2115 }
0x105a   :  { %v1867_v61 = vmul.f32 %v2116_v28, %v1864_v21  ;;  %vm1873_vm4 = vweird.f32 %v2116_v28 }
0x105b   :  { %vm1874_vm8 = vmor %vm1872_vm5, %vm1873_vm4 }
0x105c   :  { %v1868_v55 = vmul.f32 %v2116_v28, %v1867_v61 }
0x105d   :  { %v1861_v63 = vpop.xlane.xlu2 %1860 }
0x105e   :  { %v1869_v15 = vmul.f32 0.5, %v1868_v55  ;;  %v1863_v27 = vmul.f32 %v1861_v63, %v2474_v14 }
0x1060   :  { %v1870_v53 = vsub.f32 1.5, %v1869_v15  ;;  %v1865_v57 = vadd.f32 1e-05, %v1863_v27 }
0x1062   :  { %v1871_v33 = vmul.f32 %v2116_v28, %v1870_v53  ;;  %2117 = vrsqrt.f32 %v1865_v57  ;;  %vm1882_vm6 = vweird.f32 %v1865_v57 }
0x1064   :  { %v1875_v8 = vsel %vm1874_vm8, %v2116_v28, %v1871_v33 }
0x1065   :  { %v1886_v46 = vmul.f32 %v1875_v8, %v1852_v32 }
0x1067   :  { %v1889_v22 = vmul.f32 %v2031_v59, %v1886_v46 }
0x1068   :  { %v2118_v24 = vpop.eup %2117 }
0x1069   :  { %v1877_v2 = vmul.f32 %v2118_v24, %v1865_v57  ;;  %v1892_v26 = vadd.f32 %v2032_v10, %v1889_v22  ;;  %vm1883_vm1 = vweird.f32 %v2118_v24 }
0x106a   :  { %vm1884_vm7 = vmor %vm1882_vm6, %vm1883_vm1 }
0x106b   :  { %v1878_v12 = vmul.f32 %v2118_v24, %v1877_v2  ;;  %1894 = vst.msk [vmem:[#allocation7] sm:$0xff] %vm85_vm0, %v1892_v26 }
0x106d   :  { %v1879_v11 = vmul.f32 0.5, %v1878_v12 }
0x106f   :  { %v1880_v14 = vsub.f32 1.5, %v1879_v11 }
0x1071   :  { %v1881_v13 = vmul.f32 %v2118_v24, %v1880_v14 }
0x1073   :  { %v1885_v35 = vsel %vm1884_vm7, %v2118_v24, %v1881_v13 }
0x1074   :  { %v1887_v6 = vmul.f32 %v1885_v35, %v1853_v37 }
0x1076   :  { %v1890_v18 = vmul.f32 %v2031_v59, %v1887_v6 }
0x1078   :  { %v1893_v17 = vadd.f32 %v2032_v10, %v1890_v18 }
0x107a   :  { %1895 = vst.msk [vmem:[#allocation7 + $0x8] sm:$0xff] %vm85_vm0, %v1893_v17 }
0x107b   :  { %1908 = dma.vmem_to_hbm [thread:$0]  %s1901_s27, 256, %s1903_s30, [#allocation4], %s2207_s17, %s2207_s17, %s2208_s18  }
0x107c   :  { %2204 = dma.done.wait [#allocation4], 256  }
0x107d   :  { %2205 = vsyncadd [#allocation4], 4294967040 }
0x107e   :  { %1913 = vsyncpa [#allocation3], 1 }
0x107f   :  { %1914 = vsyncpa [#allocation6], 1 }
0x1080   :  { %1915 = vsyncpa [#allocation4], 1 }

</bundles_post_ra>
